<compile_context>
chip_gen: v7x
topology: tpu7x:2x2x1
jax: 0.10.0
libtpu: 0.0.40
codegen_flags: <defaults>
</compile_context>

<pallas_src>
import functools
import math

import jax
import jax.numpy as jnp
from jax.experimental import pallas as pl
from jax.experimental.pallas import tpu as pltpu


class Config:
    # Small, deterministic synthetic config consistent with CamembertConfig + output_size.
    vocab_size = 101
    hidden_size = 32
    num_hidden_layers = 2
    num_attention_heads = 4
    intermediate_size = 64
    max_position_embeddings = 40
    type_vocab_size = 1
    layer_norm_eps = 1e-12
    pad_token_id = 1
    output_size = 16


# ----------------------------------------------------------------------------
# In-kernel math helpers
# ----------------------------------------------------------------------------
def _erf_f32(x):
    # Float32-accurate erf (Abramowitz & Stegun 7.1.26, |err| <= 1.5e-7); only
    # exp/mul/add/div so it always lowers in Mosaic.  Matches torch's exact-erf
    # GELU to f32 tolerance.
    a1, a2, a3, a4, a5 = 0.254829592, -0.284496736, 1.421413741, -1.453152027, 1.061405429
    p = 0.3275911
    sign = jnp.where(x >= 0.0, 1.0, -1.0)
    ax = jnp.abs(x)
    t = 1.0 / (1.0 + p * ax)
    poly = ((((a5 * t + a4) * t + a3) * t + a2) * t + a1) * t
    return sign * (1.0 - poly * jnp.exp(-ax * ax))


def _gelu(x):
    return 0.5 * x * (1.0 + _erf_f32(x * (1.0 / math.sqrt(2.0))))


# ----------------------------------------------------------------------------
# Fused encoder kernel: embeddings-LN + all layers + pooler + entity head
# ----------------------------------------------------------------------------
def _encoder_kernel(emb_ref, bias_ref, eg_ref, eb_ref,
                    wqkv_ref, bqkv_ref, wao_ref, bao_ref, g1_ref, b1_ref,
                    wi_ref, bi_ref, wo_ref, bo_ref, g2_ref, b2_ref,
                    pw_ref, pb_ref, hw_ref, hb_ref,
                    out_ref,
                    hidden_ref,
                    *, B, S, nH, dh, eps, scale):
    H = nH * dh
    layer = pl.program_id(0)

    def layer_norm(x, g, b):
        # Biased variance over the last dim (torch LayerNorm semantics), f32 stats.
        mean = jnp.mean(x, axis=-1, keepdims=True)
        xc = x - mean
        var = jnp.mean(xc * xc, axis=-1, keepdims=True)
        return xc * jax.lax.rsqrt(var + eps) * g + b

    # ---- first grid step: embedding LayerNorm into the resident hidden state ----
    @pl.when(layer == 0)
    def _init():
        hidden_ref[...] = layer_norm(emb_ref[...], eg_ref[...], eb_ref[...])

    h = hidden_ref[...]                                     # (B*S, H), VMEM-resident

    # ---- fused QKV projection: one (B*S, H) @ (H, 3H) MXU matmul ----
    qkv = jnp.dot(h, wqkv_ref[0], preferred_element_type=jnp.float32) + bqkv_ref[0]

    # ---- multi-head self attention, fully register/VMEM resident ----
    ctx_rows = []
    for b in range(B):
        bias_b = bias_ref[b:b + 1, :]                       # (1, S) additive key mask
        qkv_b = qkv[b * S:(b + 1) * S, :]                   # (S, 3H)
        head_ctx = []
        for hd in range(nH):
            c0 = hd * dh
            q = qkv_b[:, c0:c0 + dh]                        # (S, dh)
            k = qkv_b[:, H + c0:H + c0 + dh]
            v = qkv_b[:, 2 * H + c0:2 * H + c0 + dh]
            s = jnp.dot(q, k.T, preferred_element_type=jnp.float32) * scale + bias_b
            m = jnp.max(s, axis=-1, keepdims=True)
            p = jnp.exp(s - m)
            p = p * pl.reciprocal(jnp.sum(p, axis=-1, keepdims=True), approx=True)
            head_ctx.append(jnp.dot(p, v, preferred_element_type=jnp.float32))
        ctx_rows.append(jnp.concatenate(head_ctx, axis=-1))  # (S, H)
    ctx = jnp.concatenate(ctx_rows, axis=0)                  # (B*S, H)

    # ---- attention output projection + residual + LayerNorm ----
    attn = jnp.dot(ctx, wao_ref[0], preferred_element_type=jnp.float32) + bao_ref[0]
    h1 = layer_norm(attn + h, g1_ref[0], b1_ref[0])

    # ---- feed-forward (exact-erf GELU) + residual + LayerNorm ----
    inter = _gelu(jnp.dot(h1, wi_ref[0], preferred_element_type=jnp.float32) + bi_ref[0])
    ffn = jnp.dot(inter, wo_ref[0], preferred_element_type=jnp.float32) + bo_ref[0]
    h2 = layer_norm(ffn + h1, g2_ref[0], b2_ref[0])
    hidden_ref[...] = h2

    # ---- final layer epilogue: pooler (CLS, dense+tanh) + EntityHead dense ----
    @pl.when(layer == pl.num_programs(0) - 1)
    def _epilogue():
        cls = jnp.concatenate([h2[b * S:b * S + 1, :] for b in range(B)], axis=0)  # (B, H)
        pooled = jnp.tanh(
            jnp.dot(cls, pw_ref[...], preferred_element_type=jnp.float32) + pb_ref[...])
        out_ref[...] = (jnp.dot(pooled, hw_ref[...], preferred_element_type=jnp.float32)
                        + hb_ref[...])


# ----------------------------------------------------------------------------
# Forward wrapper (embedding gathers in glue, everything else in the kernel)
# ----------------------------------------------------------------------------
def _embed(params, input_ids, config):
    pad = config.pad_token_id
    # Camembert/Roberta position ids: cumsum of non-pad tokens, offset by pad_token_id.
    not_pad = (input_ids != pad).astype(jnp.int32)
    position_ids = jnp.cumsum(not_pad, axis=1) * not_pad + pad
    emb = (jnp.take(params["word_emb"], input_ids, axis=0)
           + jnp.take(params["pos_emb"], position_ids, axis=0)
           + jnp.take(params["type_emb"], jnp.zeros_like(input_ids), axis=0))
    return emb.astype(jnp.float32)


@functools.partial(jax.jit, static_argnames=("config",))
def _forward(params, input_ids, attention_mask, config):
    B, S = input_ids.shape
    H = config.hidden_size
    nH = config.num_attention_heads
    dh = H // nH
    I = config.intermediate_size
    O = config.output_size
    L = config.num_hidden_layers

    emb = _embed(params, input_ids, config).reshape(B * S, H)
    # Additive attention-mask bias: 0 where attended, fp32-min where masked.
    bias = (1.0 - attention_mask.astype(jnp.float32)) * jnp.finfo(jnp.float32).min  # (B, S)

    def const_spec(shape):
        return pl.BlockSpec(shape, lambda l, n=len(shape): (0,) * n)

    def layer_spec(shape):  # arrays stacked as (L, ...): one layer block per grid step
        return pl.BlockSpec((1,) + shape[1:],
                            lambda l, n=len(shape) - 1: (l,) + (0,) * n)

    kernel = functools.partial(_encoder_kernel, B=B, S=S, nH=nH, dh=dh,
                               eps=config.layer_norm_eps, scale=1.0 / math.sqrt(dh))

    in_specs = [
        const_spec((B * S, H)),        # emb
        const_spec((B, S)),            # attention bias
        const_spec((1, H)),            # emb LN gamma
        const_spec((1, H)),            # emb LN beta
        layer_spec((L, H, 3 * H)),     # fused QKV weight
        layer_spec((L, 1, 3 * H)),     # fused QKV bias
        layer_spec((L, H, H)),         # attn output weight
        layer_spec((L, 1, H)),         # attn output bias
        layer_spec((L, 1, H)),         # LN1 gamma
        layer_spec((L, 1, H)),         # LN1 beta
        layer_spec((L, H, I)),         # FFN up weight
        layer_spec((L, 1, I)),         # FFN up bias
        layer_spec((L, I, H)),         # FFN down weight
        layer_spec((L, 1, H)),         # FFN down bias
        layer_spec((L, 1, H)),         # LN2 gamma
        layer_spec((L, 1, H)),         # LN2 beta
        const_spec((H, H)),            # pooler weight
        const_spec((1, H)),            # pooler bias
        const_spec((H, O)),            # entity head weight
        const_spec((1, O)),            # entity head bias
    ]

    return pl.pallas_call(
        kernel,
        out_shape=jax.ShapeDtypeStruct((B, O), jnp.float32),
        grid=(L,),
        in_specs=in_specs,
        out_specs=const_spec((B, O)),
        scratch_shapes=[
            pltpu.VMEM((B * S, H), jnp.float32),   # hidden state (persists across layers)
        ],
        compiler_params=pltpu.CompilerParams(dimension_semantics=("arbitrary",)),
    )(emb, bias,
      params["emb_ln_g"], params["emb_ln_b"],
      params["qkv_w"], params["qkv_b"],
      params["ao_w"], params["ao_b"], params["ln1_g"], params["ln1_b"],
      params["i_w"], params["i_b"], params["o_w"], params["o_b"],
      params["ln2_g"], params["ln2_b"],
      params["pool_w"], params["pool_b"], params["head_w"], params["head_b"])


def camembert_entity_encoder(params, input_ids, attention_mask, config):
    # Mirrors the torch forward's empty-batch early return.
    if input_ids.shape[0] == 0 and attention_mask.shape[0] == 0:
        return jnp.zeros((0, config.output_size), jnp.float32)
    return _forward(params, input_ids, attention_mask, config=config)


# ----------------------------------------------------------------------------
# Pure-JAX reference forward (numerics check)
# ----------------------------------------------------------------------------
def _reference_forward(params, input_ids, attention_mask, config):
    B, S = input_ids.shape
    H = config.hidden_size
    nH = config.num_attention_heads
    dh = H // nH
    L = config.num_hidden_layers
    eps = config.layer_norm_eps

    def ln(x, g, b):
        m = x.mean(-1, keepdims=True)
        v = ((x - m) ** 2).mean(-1, keepdims=True)
        return (x - m) / jnp.sqrt(v + eps) * g + b

    emb = _embed(params, input_ids, config)                                  # (B, S, H)
    bias = (1.0 - attention_mask.astype(jnp.float32)) * jnp.finfo(jnp.float32).min
    h = ln(emb, params["emb_ln_g"][0], params["emb_ln_b"][0])
    scale = 1.0 / math.sqrt(dh)
    for l in range(L):
        qkv = h @ params["qkv_w"][l] + params["qkv_b"][l]
        q, k, v = jnp.split(qkv, 3, axis=-1)

        def heads(x):
            return x.reshape(B, S, nH, dh).transpose(0, 2, 1, 3)

        q, k, v = heads(q), heads(k), heads(v)
        s = jnp.einsum("bhqd,bhkd->bhqk", q, k) * scale + bias[:, None, None, :]
        p = jax.nn.softmax(s, axis=-1)
        ctx = jnp.einsum("bhqk,bhkd->bhqd", p, v).transpose(0, 2, 1, 3).reshape(B, S, H)
        attn = ctx @ params["ao_w"][l] + params["ao_b"][l]
        h1 = ln(attn + h, params["ln1_g"][l][0], params["ln1_b"][l][0])
        inter = jax.nn.gelu(h1 @ params["i_w"][l] + params["i_b"][l], approximate=False)
        ffn = inter @ params["o_w"][l] + params["o_b"][l]
        h = ln(ffn + h1, params["ln2_g"][l][0], params["ln2_b"][l][0])
    pooled = jnp.tanh(h[:, 0, :] @ params["pool_w"] + params["pool_b"][0])
    return pooled @ params["head_w"] + params["head_b"][0]


# ----------------------------------------------------------------------------
# Deterministic synthetic parameter init (BERT-style: normal(0, 0.02), zero biases)
# ----------------------------------------------------------------------------
def init_params(config, key):
    H, I = config.hidden_size, config.intermediate_size
    L, O = config.num_hidden_layers, config.output_size
    std = 0.02
    keys = iter(jax.random.split(key, 16))

    def w(shape):
        return std * jax.random.normal(next(keys), shape, jnp.float32)

    word = w((config.vocab_size, H)).at[config.pad_token_id].set(0.0)   # padding_idx row zeroed
    pos = w((config.max_position_embeddings, H)).at[config.pad_token_id].set(0.0)
    typ = w((config.type_vocab_size, H))

    return dict(
        word_emb=word, pos_emb=pos, type_emb=typ,
        emb_ln_g=jnp.ones((1, H), jnp.float32), emb_ln_b=jnp.zeros((1, H), jnp.float32),
        qkv_w=w((L, H, 3 * H)), qkv_b=jnp.zeros((L, 1, 3 * H), jnp.float32),
        ao_w=w((L, H, H)), ao_b=jnp.zeros((L, 1, H), jnp.float32),
        ln1_g=jnp.ones((L, 1, H), jnp.float32), ln1_b=jnp.zeros((L, 1, H), jnp.float32),
        i_w=w((L, H, I)), i_b=jnp.zeros((L, 1, I), jnp.float32),
        o_w=w((L, I, H)), o_b=jnp.zeros((L, 1, H), jnp.float32),
        ln2_g=jnp.ones((L, 1, H), jnp.float32), ln2_b=jnp.zeros((L, 1, H), jnp.float32),
        pool_w=w((H, H)), pool_b=jnp.zeros((1, H), jnp.float32),
        head_w=w((H, O)), head_b=jnp.zeros((1, O), jnp.float32),
    )


if __name__ == "__main__":
    config = Config()
    pkey, ikey = jax.random.split(jax.random.PRNGKey(0))
    params = init_params(config, pkey)

    B, S = 2, 8
    input_ids = jax.random.randint(ikey, (B, S), 5, config.vocab_size, dtype=jnp.int32)
    input_ids = input_ids.at[1, 5:].set(config.pad_token_id)   # pad tail of second sequence
    attention_mask = (input_ids != config.pad_token_id).astype(jnp.int32)

    out = camembert_entity_encoder(params, input_ids, attention_mask, config)
    out = jax.block_until_ready(out)
    assert out.shape == (B, config.output_size), out.shape
    assert bool(jnp.all(jnp.isfinite(out)))

    ref = _reference_forward(params, input_ids, attention_mask, config)
    assert bool(jnp.allclose(out, ref, atol=1e-3, rtol=1e-2)), (out, ref)

    print("KERNEL_OK")
</pallas_src>

<mosaic_0001>
module attributes {stable_mosaic.version = 11 : i64} {
  func.func @_encoder_kernel(%arg0: i32, %arg1: memref<16x32xf32, #tpu.memory_space<vmem>>, %arg2: memref<2x8xf32, #tpu.memory_space<vmem>>, %arg3: memref<1x32xf32, #tpu.memory_space<vmem>>, %arg4: memref<1x32xf32, #tpu.memory_space<vmem>>, %arg5: memref<1x32x96xf32, #tpu.memory_space<vmem>>, %arg6: memref<1x1x96xf32, #tpu.memory_space<vmem>>, %arg7: memref<1x32x32xf32, #tpu.memory_space<vmem>>, %arg8: memref<1x1x32xf32, #tpu.memory_space<vmem>>, %arg9: memref<1x1x32xf32, #tpu.memory_space<vmem>>, %arg10: memref<1x1x32xf32, #tpu.memory_space<vmem>>, %arg11: memref<1x32x64xf32, #tpu.memory_space<vmem>>, %arg12: memref<1x1x64xf32, #tpu.memory_space<vmem>>, %arg13: memref<1x64x32xf32, #tpu.memory_space<vmem>>, %arg14: memref<1x1x32xf32, #tpu.memory_space<vmem>>, %arg15: memref<1x1x32xf32, #tpu.memory_space<vmem>>, %arg16: memref<1x1x32xf32, #tpu.memory_space<vmem>>, %arg17: memref<32x32xf32, #tpu.memory_space<vmem>>, %arg18: memref<1x32xf32, #tpu.memory_space<vmem>>, %arg19: memref<32x16xf32, #tpu.memory_space<vmem>>, %arg20: memref<1x16xf32, #tpu.memory_space<vmem>>, %arg21: memref<2x16xf32, #tpu.memory_space<vmem>>, %arg22: memref<16x32xf32, #tpu.memory_space<vmem>>) attributes {dimension_semantics = [#tpu.dimension_semantics<arbitrary>], iteration_bounds = array<i64: 2>, scalar_prefetch = 0 : i64, scratch_operands = 1 : i64, tpu.core_type = #tpu.core_type<tc>, window_params = [{pipeline_mode = #tpu.pipeline_mode<synchronous>, transform_indices = @transform_0, window_bounds = array<i64: 16, 32>}, {pipeline_mode = #tpu.pipeline_mode<synchronous>, transform_indices = @transform_1, window_bounds = array<i64: 2, 8>}, {pipeline_mode = #tpu.pipeline_mode<synchronous>, transform_indices = @transform_2, window_bounds = array<i64: 1, 32>}, {pipeline_mode = #tpu.pipeline_mode<synchronous>, transform_indices = @transform_3, window_bounds = array<i64: 1, 32>}, {transform_indices = @transform_4, window_bounds = array<i64: 1, 32, 96>}, {transform_indices = @transform_5, window_bounds = array<i64: 1, 1, 96>}, {transform_indices = @transform_6, window_bounds = array<i64: 1, 32, 32>}, {transform_indices = @transform_7, window_bounds = array<i64: 1, 1, 32>}, {transform_indices = @transform_8, window_bounds = array<i64: 1, 1, 32>}, {transform_indices = @transform_9, window_bounds = array<i64: 1, 1, 32>}, {transform_indices = @transform_10, window_bounds = array<i64: 1, 32, 64>}, {transform_indices = @transform_11, window_bounds = array<i64: 1, 1, 64>}, {transform_indices = @transform_12, window_bounds = array<i64: 1, 64, 32>}, {transform_indices = @transform_13, window_bounds = array<i64: 1, 1, 32>}, {transform_indices = @transform_14, window_bounds = array<i64: 1, 1, 32>}, {transform_indices = @transform_15, window_bounds = array<i64: 1, 1, 32>}, {pipeline_mode = #tpu.pipeline_mode<synchronous>, transform_indices = @transform_16, window_bounds = array<i64: 32, 32>}, {pipeline_mode = #tpu.pipeline_mode<synchronous>, transform_indices = @transform_17, window_bounds = array<i64: 1, 32>}, {pipeline_mode = #tpu.pipeline_mode<synchronous>, transform_indices = @transform_18, window_bounds = array<i64: 32, 16>}, {pipeline_mode = #tpu.pipeline_mode<synchronous>, transform_indices = @transform_19, window_bounds = array<i64: 1, 16>}, {pipeline_mode = #tpu.pipeline_mode<synchronous>, transform_indices = @transform_20, window_bounds = array<i64: 2, 16>}]} {
    %c0_i32 = arith.constant 0 : i32
    %0 = arith.cmpi eq, %arg0, %c0_i32 : i32
    %1 = arith.extui %0 : i1 to i32
    %c0_i32_0 = arith.constant 0 : i32
    %2 = arith.cmpi ne, %1, %c0_i32_0 : i32
    scf.if %2 {
      %c0_113 = arith.constant 0 : index
      %c0_114 = arith.constant 0 : index
      %294 = vector.load %arg1[%c0_113, %c0_114] : memref<16x32xf32, #tpu.memory_space<vmem>>, vector<16x32xf32>
      %c0_115 = arith.constant 0 : index
      %c0_116 = arith.constant 0 : index
      %295 = vector.load %arg3[%c0_115, %c0_116] : memref<1x32xf32, #tpu.memory_space<vmem>>, vector<1x32xf32>
      %c0_117 = arith.constant 0 : index
      %c0_118 = arith.constant 0 : index
      %296 = vector.load %arg4[%c0_117, %c0_118] : memref<1x32xf32, #tpu.memory_space<vmem>>, vector<1x32xf32>
      %cst_119 = arith.constant dense<0.000000e+00> : vector<16xf32>
      %297 = vector.multi_reduction <add>, %294, %cst_119 [1] : vector<16x32xf32> to vector<16xf32>
      %298 = vector.shape_cast %297 : vector<16xf32> to vector<16x1xf32>
      %cst_120 = arith.constant 3.200000e+01 : f32
      %299 = vector.broadcast %cst_120 : f32 to vector<16x1xf32>
      %300 = arith.divf %298, %299 : vector<16x1xf32>
      %301 = vector.broadcast %300 : vector<16x1xf32> to vector<16x32xf32>
      %302 = arith.subf %294, %301 : vector<16x32xf32>
      %303 = arith.mulf %302, %302 : vector<16x32xf32>
      %cst_121 = arith.constant dense<0.000000e+00> : vector<16xf32>
      %304 = vector.multi_reduction <add>, %303, %cst_121 [1] : vector<16x32xf32> to vector<16xf32>
      %305 = vector.shape_cast %304 : vector<16xf32> to vector<16x1xf32>
      %cst_122 = arith.constant 3.200000e+01 : f32
      %306 = vector.broadcast %cst_122 : f32 to vector<16x1xf32>
      %307 = arith.divf %305, %306 : vector<16x1xf32>
      %cst_123 = arith.constant 9.99999996E-13 : f32
      %308 = vector.broadcast %cst_123 : f32 to vector<16x1xf32>
      %309 = arith.addf %307, %308 : vector<16x1xf32>
      %310 = math.rsqrt %309 : vector<16x1xf32>
      %311 = vector.broadcast %310 : vector<16x1xf32> to vector<16x32xf32>
      %312 = arith.mulf %302, %311 : vector<16x32xf32>
      %313 = vector.broadcast %295 : vector<1x32xf32> to vector<16x32xf32>
      %314 = arith.mulf %312, %313 : vector<16x32xf32>
      %315 = vector.broadcast %296 : vector<1x32xf32> to vector<16x32xf32>
      %316 = arith.addf %314, %315 : vector<16x32xf32>
      %c0_124 = arith.constant 0 : index
      %c0_125 = arith.constant 0 : index
      %317 = vector.load %arg22[%c0_124, %c0_125] : memref<16x32xf32, #tpu.memory_space<vmem>>, vector<16x32xf32>
      tpu.vector_store %arg22[%c0_124, %c0_125], %316 {strides = array<i32>} : memref<16x32xf32, #tpu.memory_space<vmem>>, vector<16x32xf32>,
    } else {
    }
    %c0 = arith.constant 0 : index
    %c0_1 = arith.constant 0 : index
    %3 = vector.load %arg22[%c0, %c0_1] : memref<16x32xf32, #tpu.memory_space<vmem>>, vector<16x32xf32>
    %c0_2 = arith.constant 0 : index
    %c0_3 = arith.constant 0 : index
    %c0_4 = arith.constant 0 : index
    %4 = vector.load %arg5[%c0_2, %c0_3, %c0_4] : memref<1x32x96xf32, #tpu.memory_space<vmem>>, vector<1x32x96xf32>
    %5 = vector.shape_cast %4 : vector<1x32x96xf32> to vector<32x96xf32>
    %cst = arith.constant dense<0.000000e+00> : vector<16x96xf32>
    %6 = tpu.matmul %3, %5, %cst {dimension_numbers = #tpu.dot_dimension_numbers<[1], [0], [0], [1], [0, 0, 1, 1], [], []>} : vector<16x32xf32>, vector<32x96xf32>, vector<16x96xf32> -> vector<16x96xf32>
    %c0_5 = arith.constant 0 : index
    %c0_6 = arith.constant 0 : index
    %c0_7 = arith.constant 0 : index
    %7 = vector.load %arg6[%c0_5, %c0_6, %c0_7] : memref<1x1x96xf32, #tpu.memory_space<vmem>>, vector<1x1x96xf32>
    %8 = vector.shape_cast %7 : vector<1x1x96xf32> to vector<1x96xf32>
    %9 = vector.broadcast %8 : vector<1x96xf32> to vector<16x96xf32>
    %10 = arith.addf %6, %9 : vector<16x96xf32>
    %c0_8 = arith.constant 0 : index
    %c0_9 = arith.constant 0 : index
    %11 = vector.load %arg2[%c0_8, %c0_9] : memref<2x8xf32, #tpu.memory_space<vmem>>, vector<1x8xf32>
    %12 = vector.extract_strided_slice %10 {offsets = [0, 0], sizes = [8, 96], strides = [1, 1]} : vector<16x96xf32> to vector<8x96xf32>
    %13 = vector.extract_strided_slice %12 {offsets = [0, 0], sizes = [8, 8], strides = [1, 1]} : vector<8x96xf32> to vector<8x8xf32>
    %14 = vector.extract_strided_slice %12 {offsets = [0, 32], sizes = [8, 8], strides = [1, 1]} : vector<8x96xf32> to vector<8x8xf32>
    %15 = vector.extract_strided_slice %12 {offsets = [0, 64], sizes = [8, 8], strides = [1, 1]} : vector<8x96xf32> to vector<8x8xf32>
    %16 = tpu.transpose %14, [1, 0] : vector<8x8xf32> -> vector<8x8xf32>
    %cst_10 = arith.constant dense<0.000000e+00> : vector<8x8xf32>
    %17 = tpu.matmul %13, %16, %cst_10 {dimension_numbers = #tpu.dot_dimension_numbers<[1], [0], [0], [1], [0, 0, 1, 1], [], []>} : vector<8x8xf32>, vector<8x8xf32>, vector<8x8xf32> -> vector<8x8xf32>
    %cst_11 = arith.constant 0.353553385 : f32
    %18 = vector.broadcast %cst_11 : f32 to vector<8x8xf32>
    %19 = arith.mulf %17, %18 : vector<8x8xf32>
    %20 = vector.broadcast %11 : vector<1x8xf32> to vector<8x8xf32>
    %21 = arith.addf %19, %20 : vector<8x8xf32>
    %cst_12 = arith.constant dense<0xFF800000> : vector<8xf32>
    %22 = vector.multi_reduction <maximumf>, %21, %cst_12 [1] : vector<8x8xf32> to vector<8xf32>
    %23 = vector.shape_cast %22 : vector<8xf32> to vector<8x1xf32>
    %24 = vector.broadcast %23 : vector<8x1xf32> to vector<8x8xf32>
    %25 = arith.subf %21, %24 : vector<8x8xf32>
    %26 = math.exp %25 : vector<8x8xf32>
    %cst_13 = arith.constant dense<0.000000e+00> : vector<8xf32>
    %27 = vector.multi_reduction <add>, %26, %cst_13 [1] : vector<8x8xf32> to vector<8xf32>
    %28 = vector.shape_cast %27 : vector<8xf32> to vector<8x1xf32>
    %29 = tpu.reciprocal %28 {approx = true} : vector<8x1xf32> -> vector<8x1xf32>
    %30 = vector.broadcast %29 : vector<8x1xf32> to vector<8x8xf32>
    %31 = arith.mulf %26, %30 : vector<8x8xf32>
    %cst_14 = arith.constant dense<0.000000e+00> : vector<8x8xf32>
    %32 = tpu.matmul %31, %15, %cst_14 {dimension_numbers = #tpu.dot_dimension_numbers<[1], [0], [0], [1], [0, 0, 1, 1], [], []>} : vector<8x8xf32>, vector<8x8xf32>, vector<8x8xf32> -> vector<8x8xf32>
    %33 = vector.extract_strided_slice %12 {offsets = [0, 8], sizes = [8, 8], strides = [1, 1]} : vector<8x96xf32> to vector<8x8xf32>
    %34 = vector.extract_strided_slice %12 {offsets = [0, 40], sizes = [8, 8], strides = [1, 1]} : vector<8x96xf32> to vector<8x8xf32>
    %35 = vector.extract_strided_slice %12 {offsets = [0, 72], sizes = [8, 8], strides = [1, 1]} : vector<8x96xf32> to vector<8x8xf32>
    %36 = tpu.transpose %34, [1, 0] : vector<8x8xf32> -> vector<8x8xf32>
    %cst_15 = arith.constant dense<0.000000e+00> : vector<8x8xf32>
    %37 = tpu.matmul %33, %36, %cst_15 {dimension_numbers = #tpu.dot_dimension_numbers<[1], [0], [0], [1], [0, 0, 1, 1], [], []>} : vector<8x8xf32>, vector<8x8xf32>, vector<8x8xf32> -> vector<8x8xf32>
    %cst_16 = arith.constant 0.353553385 : f32
    %38 = vector.broadcast %cst_16 : f32 to vector<8x8xf32>
    %39 = arith.mulf %37, %38 : vector<8x8xf32>
    %40 = vector.broadcast %11 : vector<1x8xf32> to vector<8x8xf32>
    %41 = arith.addf %39, %40 : vector<8x8xf32>
    %cst_17 = arith.constant dense<0xFF800000> : vector<8xf32>
    %42 = vector.multi_reduction <maximumf>, %41, %cst_17 [1] : vector<8x8xf32> to vector<8xf32>
    %43 = vector.shape_cast %42 : vector<8xf32> to vector<8x1xf32>
    %44 = vector.broadcast %43 : vector<8x1xf32> to vector<8x8xf32>
    %45 = arith.subf %41, %44 : vector<8x8xf32>
    %46 = math.exp %45 : vector<8x8xf32>
    %cst_18 = arith.constant dense<0.000000e+00> : vector<8xf32>
    %47 = vector.multi_reduction <add>, %46, %cst_18 [1] : vector<8x8xf32> to vector<8xf32>
    %48 = vector.shape_cast %47 : vector<8xf32> to vector<8x1xf32>
    %49 = tpu.reciprocal %48 {approx = true} : vector<8x1xf32> -> vector<8x1xf32>
    %50 = vector.broadcast %49 : vector<8x1xf32> to vector<8x8xf32>
    %51 = arith.mulf %46, %50 : vector<8x8xf32>
    %cst_19 = arith.constant dense<0.000000e+00> : vector<8x8xf32>
    %52 = tpu.matmul %51, %35, %cst_19 {dimension_numbers = #tpu.dot_dimension_numbers<[1], [0], [0], [1], [0, 0, 1, 1], [], []>} : vector<8x8xf32>, vector<8x8xf32>, vector<8x8xf32> -> vector<8x8xf32>
    %53 = vector.extract_strided_slice %12 {offsets = [0, 16], sizes = [8, 8], strides = [1, 1]} : vector<8x96xf32> to vector<8x8xf32>
    %54 = vector.extract_strided_slice %12 {offsets = [0, 48], sizes = [8, 8], strides = [1, 1]} : vector<8x96xf32> to vector<8x8xf32>
    %55 = vector.extract_strided_slice %12 {offsets = [0, 80], sizes = [8, 8], strides = [1, 1]} : vector<8x96xf32> to vector<8x8xf32>
    %56 = tpu.transpose %54, [1, 0] : vector<8x8xf32> -> vector<8x8xf32>
    %cst_20 = arith.constant dense<0.000000e+00> : vector<8x8xf32>
    %57 = tpu.matmul %53, %56, %cst_20 {dimension_numbers = #tpu.dot_dimension_numbers<[1], [0], [0], [1], [0, 0, 1, 1], [], []>} : vector<8x8xf32>, vector<8x8xf32>, vector<8x8xf32> -> vector<8x8xf32>
    %cst_21 = arith.constant 0.353553385 : f32
    %58 = vector.broadcast %cst_21 : f32 to vector<8x8xf32>
    %59 = arith.mulf %57, %58 : vector<8x8xf32>
    %60 = vector.broadcast %11 : vector<1x8xf32> to vector<8x8xf32>
    %61 = arith.addf %59, %60 : vector<8x8xf32>
    %cst_22 = arith.constant dense<0xFF800000> : vector<8xf32>
    %62 = vector.multi_reduction <maximumf>, %61, %cst_22 [1] : vector<8x8xf32> to vector<8xf32>
    %63 = vector.shape_cast %62 : vector<8xf32> to vector<8x1xf32>
    %64 = vector.broadcast %63 : vector<8x1xf32> to vector<8x8xf32>
    %65 = arith.subf %61, %64 : vector<8x8xf32>
    %66 = math.exp %65 : vector<8x8xf32>
    %cst_23 = arith.constant dense<0.000000e+00> : vector<8xf32>
    %67 = vector.multi_reduction <add>, %66, %cst_23 [1] : vector<8x8xf32> to vector<8xf32>
    %68 = vector.shape_cast %67 : vector<8xf32> to vector<8x1xf32>
    %69 = tpu.reciprocal %68 {approx = true} : vector<8x1xf32> -> vector<8x1xf32>
    %70 = vector.broadcast %69 : vector<8x1xf32> to vector<8x8xf32>
    %71 = arith.mulf %66, %70 : vector<8x8xf32>
    %cst_24 = arith.constant dense<0.000000e+00> : vector<8x8xf32>
    %72 = tpu.matmul %71, %55, %cst_24 {dimension_numbers = #tpu.dot_dimension_numbers<[1], [0], [0], [1], [0, 0, 1, 1], [], []>} : vector<8x8xf32>, vector<8x8xf32>, vector<8x8xf32> -> vector<8x8xf32>
    %73 = vector.extract_strided_slice %12 {offsets = [0, 24], sizes = [8, 8], strides = [1, 1]} : vector<8x96xf32> to vector<8x8xf32>
    %74 = vector.extract_strided_slice %12 {offsets = [0, 56], sizes = [8, 8], strides = [1, 1]} : vector<8x96xf32> to vector<8x8xf32>
    %75 = vector.extract_strided_slice %12 {offsets = [0, 88], sizes = [8, 8], strides = [1, 1]} : vector<8x96xf32> to vector<8x8xf32>
    %76 = tpu.transpose %74, [1, 0] : vector<8x8xf32> -> vector<8x8xf32>
    %cst_25 = arith.constant dense<0.000000e+00> : vector<8x8xf32>
    %77 = tpu.matmul %73, %76, %cst_25 {dimension_numbers = #tpu.dot_dimension_numbers<[1], [0], [0], [1], [0, 0, 1, 1], [], []>} : vector<8x8xf32>, vector<8x8xf32>, vector<8x8xf32> -> vector<8x8xf32>
    %cst_26 = arith.constant 0.353553385 : f32
    %78 = vector.broadcast %cst_26 : f32 to vector<8x8xf32>
    %79 = arith.mulf %77, %78 : vector<8x8xf32>
    %80 = vector.broadcast %11 : vector<1x8xf32> to vector<8x8xf32>
    %81 = arith.addf %79, %80 : vector<8x8xf32>
    %cst_27 = arith.constant dense<0xFF800000> : vector<8xf32>
    %82 = vector.multi_reduction <maximumf>, %81, %cst_27 [1] : vector<8x8xf32> to vector<8xf32>
    %83 = vector.shape_cast %82 : vector<8xf32> to vector<8x1xf32>
    %84 = vector.broadcast %83 : vector<8x1xf32> to vector<8x8xf32>
    %85 = arith.subf %81, %84 : vector<8x8xf32>
    %86 = math.exp %85 : vector<8x8xf32>
    %cst_28 = arith.constant dense<0.000000e+00> : vector<8xf32>
    %87 = vector.multi_reduction <add>, %86, %cst_28 [1] : vector<8x8xf32> to vector<8xf32>
    %88 = vector.shape_cast %87 : vector<8xf32> to vector<8x1xf32>
    %89 = tpu.reciprocal %88 {approx = true} : vector<8x1xf32> -> vector<8x1xf32>
    %90 = vector.broadcast %89 : vector<8x1xf32> to vector<8x8xf32>
    %91 = arith.mulf %86, %90 : vector<8x8xf32>
    %cst_29 = arith.constant dense<0.000000e+00> : vector<8x8xf32>
    %92 = tpu.matmul %91, %75, %cst_29 {dimension_numbers = #tpu.dot_dimension_numbers<[1], [0], [0], [1], [0, 0, 1, 1], [], []>} : vector<8x8xf32>, vector<8x8xf32>, vector<8x8xf32> -> vector<8x8xf32>
    %93 = tpu.concatenate %32, %52, %72, %92 in 1 : vector<8x8xf32>, vector<8x8xf32>, vector<8x8xf32>, vector<8x8xf32> -> vector<8x32xf32>
    %c1 = arith.constant 1 : index
    %c0_30 = arith.constant 0 : index
    %94 = vector.load %arg2[%c1, %c0_30] : memref<2x8xf32, #tpu.memory_space<vmem>>, vector<1x8xf32>
    %95 = vector.extract_strided_slice %10 {offsets = [8, 0], sizes = [8, 96], strides = [1, 1]} : vector<16x96xf32> to vector<8x96xf32>
    %96 = vector.extract_strided_slice %95 {offsets = [0, 0], sizes = [8, 8], strides = [1, 1]} : vector<8x96xf32> to vector<8x8xf32>
    %97 = vector.extract_strided_slice %95 {offsets = [0, 32], sizes = [8, 8], strides = [1, 1]} : vector<8x96xf32> to vector<8x8xf32>
    %98 = vector.extract_strided_slice %95 {offsets = [0, 64], sizes = [8, 8], strides = [1, 1]} : vector<8x96xf32> to vector<8x8xf32>
    %99 = tpu.transpose %97, [1, 0] : vector<8x8xf32> -> vector<8x8xf32>
    %cst_31 = arith.constant dense<0.000000e+00> : vector<8x8xf32>
    %100 = tpu.matmul %96, %99, %cst_31 {dimension_numbers = #tpu.dot_dimension_numbers<[1], [0], [0], [1], [0, 0, 1, 1], [], []>} : vector<8x8xf32>, vector<8x8xf32>, vector<8x8xf32> -> vector<8x8xf32>
    %cst_32 = arith.constant 0.353553385 : f32
    %101 = vector.broadcast %cst_32 : f32 to vector<8x8xf32>
    %102 = arith.mulf %100, %101 : vector<8x8xf32>
    %103 = vector.broadcast %94 : vector<1x8xf32> to vector<8x8xf32>
    %104 = arith.addf %102, %103 : vector<8x8xf32>
    %cst_33 = arith.constant dense<0xFF800000> : vector<8xf32>
    %105 = vector.multi_reduction <maximumf>, %104, %cst_33 [1] : vector<8x8xf32> to vector<8xf32>
    %106 = vector.shape_cast %105 : vector<8xf32> to vector<8x1xf32>
    %107 = vector.broadcast %106 : vector<8x1xf32> to vector<8x8xf32>
    %108 = arith.subf %104, %107 : vector<8x8xf32>
    %109 = math.exp %108 : vector<8x8xf32>
    %cst_34 = arith.constant dense<0.000000e+00> : vector<8xf32>
    %110 = vector.multi_reduction <add>, %109, %cst_34 [1] : vector<8x8xf32> to vector<8xf32>
    %111 = vector.shape_cast %110 : vector<8xf32> to vector<8x1xf32>
    %112 = tpu.reciprocal %111 {approx = true} : vector<8x1xf32> -> vector<8x1xf32>
    %113 = vector.broadcast %112 : vector<8x1xf32> to vector<8x8xf32>
    %114 = arith.mulf %109, %113 : vector<8x8xf32>
    %cst_35 = arith.constant dense<0.000000e+00> : vector<8x8xf32>
    %115 = tpu.matmul %114, %98, %cst_35 {dimension_numbers = #tpu.dot_dimension_numbers<[1], [0], [0], [1], [0, 0, 1, 1], [], []>} : vector<8x8xf32>, vector<8x8xf32>, vector<8x8xf32> -> vector<8x8xf32>
    %116 = vector.extract_strided_slice %95 {offsets = [0, 8], sizes = [8, 8], strides = [1, 1]} : vector<8x96xf32> to vector<8x8xf32>
    %117 = vector.extract_strided_slice %95 {offsets = [0, 40], sizes = [8, 8], strides = [1, 1]} : vector<8x96xf32> to vector<8x8xf32>
    %118 = vector.extract_strided_slice %95 {offsets = [0, 72], sizes = [8, 8], strides = [1, 1]} : vector<8x96xf32> to vector<8x8xf32>
    %119 = tpu.transpose %117, [1, 0] : vector<8x8xf32> -> vector<8x8xf32>
    %cst_36 = arith.constant dense<0.000000e+00> : vector<8x8xf32>
    %120 = tpu.matmul %116, %119, %cst_36 {dimension_numbers = #tpu.dot_dimension_numbers<[1], [0], [0], [1], [0, 0, 1, 1], [], []>} : vector<8x8xf32>, vector<8x8xf32>, vector<8x8xf32> -> vector<8x8xf32>
    %cst_37 = arith.constant 0.353553385 : f32
    %121 = vector.broadcast %cst_37 : f32 to vector<8x8xf32>
    %122 = arith.mulf %120, %121 : vector<8x8xf32>
    %123 = vector.broadcast %94 : vector<1x8xf32> to vector<8x8xf32>
    %124 = arith.addf %122, %123 : vector<8x8xf32>
    %cst_38 = arith.constant dense<0xFF800000> : vector<8xf32>
    %125 = vector.multi_reduction <maximumf>, %124, %cst_38 [1] : vector<8x8xf32> to vector<8xf32>
    %126 = vector.shape_cast %125 : vector<8xf32> to vector<8x1xf32>
    %127 = vector.broadcast %126 : vector<8x1xf32> to vector<8x8xf32>
    %128 = arith.subf %124, %127 : vector<8x8xf32>
    %129 = math.exp %128 : vector<8x8xf32>
    %cst_39 = arith.constant dense<0.000000e+00> : vector<8xf32>
    %130 = vector.multi_reduction <add>, %129, %cst_39 [1] : vector<8x8xf32> to vector<8xf32>
    %131 = vector.shape_cast %130 : vector<8xf32> to vector<8x1xf32>
    %132 = tpu.reciprocal %131 {approx = true} : vector<8x1xf32> -> vector<8x1xf32>
    %133 = vector.broadcast %132 : vector<8x1xf32> to vector<8x8xf32>
    %134 = arith.mulf %129, %133 : vector<8x8xf32>
    %cst_40 = arith.constant dense<0.000000e+00> : vector<8x8xf32>
    %135 = tpu.matmul %134, %118, %cst_40 {dimension_numbers = #tpu.dot_dimension_numbers<[1], [0], [0], [1], [0, 0, 1, 1], [], []>} : vector<8x8xf32>, vector<8x8xf32>, vector<8x8xf32> -> vector<8x8xf32>
    %136 = vector.extract_strided_slice %95 {offsets = [0, 16], sizes = [8, 8], strides = [1, 1]} : vector<8x96xf32> to vector<8x8xf32>
    %137 = vector.extract_strided_slice %95 {offsets = [0, 48], sizes = [8, 8], strides = [1, 1]} : vector<8x96xf32> to vector<8x8xf32>
    %138 = vector.extract_strided_slice %95 {offsets = [0, 80], sizes = [8, 8], strides = [1, 1]} : vector<8x96xf32> to vector<8x8xf32>
    %139 = tpu.transpose %137, [1, 0] : vector<8x8xf32> -> vector<8x8xf32>
    %cst_41 = arith.constant dense<0.000000e+00> : vector<8x8xf32>
    %140 = tpu.matmul %136, %139, %cst_41 {dimension_numbers = #tpu.dot_dimension_numbers<[1], [0], [0], [1], [0, 0, 1, 1], [], []>} : vector<8x8xf32>, vector<8x8xf32>, vector<8x8xf32> -> vector<8x8xf32>
    %cst_42 = arith.constant 0.353553385 : f32
    %141 = vector.broadcast %cst_42 : f32 to vector<8x8xf32>
    %142 = arith.mulf %140, %141 : vector<8x8xf32>
    %143 = vector.broadcast %94 : vector<1x8xf32> to vector<8x8xf32>
    %144 = arith.addf %142, %143 : vector<8x8xf32>
    %cst_43 = arith.constant dense<0xFF800000> : vector<8xf32>
    %145 = vector.multi_reduction <maximumf>, %144, %cst_43 [1] : vector<8x8xf32> to vector<8xf32>
    %146 = vector.shape_cast %145 : vector<8xf32> to vector<8x1xf32>
    %147 = vector.broadcast %146 : vector<8x1xf32> to vector<8x8xf32>
    %148 = arith.subf %144, %147 : vector<8x8xf32>
    %149 = math.exp %148 : vector<8x8xf32>
    %cst_44 = arith.constant dense<0.000000e+00> : vector<8xf32>
    %150 = vector.multi_reduction <add>, %149, %cst_44 [1] : vector<8x8xf32> to vector<8xf32>
    %151 = vector.shape_cast %150 : vector<8xf32> to vector<8x1xf32>
    %152 = tpu.reciprocal %151 {approx = true} : vector<8x1xf32> -> vector<8x1xf32>
    %153 = vector.broadcast %152 : vector<8x1xf32> to vector<8x8xf32>
    %154 = arith.mulf %149, %153 : vector<8x8xf32>
    %cst_45 = arith.constant dense<0.000000e+00> : vector<8x8xf32>
    %155 = tpu.matmul %154, %138, %cst_45 {dimension_numbers = #tpu.dot_dimension_numbers<[1], [0], [0], [1], [0, 0, 1, 1], [], []>} : vector<8x8xf32>, vector<8x8xf32>, vector<8x8xf32> -> vector<8x8xf32>
    %156 = vector.extract_strided_slice %95 {offsets = [0, 24], sizes = [8, 8], strides = [1, 1]} : vector<8x96xf32> to vector<8x8xf32>
    %157 = vector.extract_strided_slice %95 {offsets = [0, 56], sizes = [8, 8], strides = [1, 1]} : vector<8x96xf32> to vector<8x8xf32>
    %158 = vector.extract_strided_slice %95 {offsets = [0, 88], sizes = [8, 8], strides = [1, 1]} : vector<8x96xf32> to vector<8x8xf32>
    %159 = tpu.transpose %157, [1, 0] : vector<8x8xf32> -> vector<8x8xf32>
    %cst_46 = arith.constant dense<0.000000e+00> : vector<8x8xf32>
    %160 = tpu.matmul %156, %159, %cst_46 {dimension_numbers = #tpu.dot_dimension_numbers<[1], [0], [0], [1], [0, 0, 1, 1], [], []>} : vector<8x8xf32>, vector<8x8xf32>, vector<8x8xf32> -> vector<8x8xf32>
    %cst_47 = arith.constant 0.353553385 : f32
    %161 = vector.broadcast %cst_47 : f32 to vector<8x8xf32>
    %162 = arith.mulf %160, %161 : vector<8x8xf32>
    %163 = vector.broadcast %94 : vector<1x8xf32> to vector<8x8xf32>
    %164 = arith.addf %162, %163 : vector<8x8xf32>
    %cst_48 = arith.constant dense<0xFF800000> : vector<8xf32>
    %165 = vector.multi_reduction <maximumf>, %164, %cst_48 [1] : vector<8x8xf32> to vector<8xf32>
    %166 = vector.shape_cast %165 : vector<8xf32> to vector<8x1xf32>
    %167 = vector.broadcast %166 : vector<8x1xf32> to vector<8x8xf32>
    %168 = arith.subf %164, %167 : vector<8x8xf32>
    %169 = math.exp %168 : vector<8x8xf32>
    %cst_49 = arith.constant dense<0.000000e+00> : vector<8xf32>
    %170 = vector.multi_reduction <add>, %169, %cst_49 [1] : vector<8x8xf32> to vector<8xf32>
    %171 = vector.shape_cast %170 : vector<8xf32> to vector<8x1xf32>
    %172 = tpu.reciprocal %171 {approx = true} : vector<8x1xf32> -> vector<8x1xf32>
    %173 = vector.broadcast %172 : vector<8x1xf32> to vector<8x8xf32>
    %174 = arith.mulf %169, %173 : vector<8x8xf32>
    %cst_50 = arith.constant dense<0.000000e+00> : vector<8x8xf32>
    %175 = tpu.matmul %174, %158, %cst_50 {dimension_numbers = #tpu.dot_dimension_numbers<[1], [0], [0], [1], [0, 0, 1, 1], [], []>} : vector<8x8xf32>, vector<8x8xf32>, vector<8x8xf32> -> vector<8x8xf32>
    %176 = tpu.concatenate %115, %135, %155, %175 in 1 : vector<8x8xf32>, vector<8x8xf32>, vector<8x8xf32>, vector<8x8xf32> -> vector<8x32xf32>
    %177 = tpu.concatenate %93, %176 in 0 : vector<8x32xf32>, vector<8x32xf32> -> vector<16x32xf32>
    %c0_51 = arith.constant 0 : index
    %c0_52 = arith.constant 0 : index
    %c0_53 = arith.constant 0 : index
    %178 = vector.load %arg7[%c0_51, %c0_52, %c0_53] : memref<1x32x32xf32, #tpu.memory_space<vmem>>, vector<1x32x32xf32>
    %179 = vector.shape_cast %178 : vector<1x32x32xf32> to vector<32x32xf32>
    %cst_54 = arith.constant dense<0.000000e+00> : vector<16x32xf32>
    %180 = tpu.matmul %177, %179, %cst_54 {dimension_numbers = #tpu.dot_dimension_numbers<[1], [0], [0], [1], [0, 0, 1, 1], [], []>} : vector<16x32xf32>, vector<32x32xf32>, vector<16x32xf32> -> vector<16x32xf32>
    %c0_55 = arith.constant 0 : index
    %c0_56 = arith.constant 0 : index
    %c0_57 = arith.constant 0 : index
    %181 = vector.load %arg8[%c0_55, %c0_56, %c0_57] : memref<1x1x32xf32, #tpu.memory_space<vmem>>, vector<1x1x32xf32>
    %182 = vector.shape_cast %181 : vector<1x1x32xf32> to vector<1x32xf32>
    %183 = vector.broadcast %182 : vector<1x32xf32> to vector<16x32xf32>
    %184 = arith.addf %180, %183 : vector<16x32xf32>
    %185 = arith.addf %184, %3 : vector<16x32xf32>
    %c0_58 = arith.constant 0 : index
    %c0_59 = arith.constant 0 : index
    %c0_60 = arith.constant 0 : index
    %186 = vector.load %arg9[%c0_58, %c0_59, %c0_60] : memref<1x1x32xf32, #tpu.memory_space<vmem>>, vector<1x1x32xf32>
    %187 = vector.shape_cast %186 : vector<1x1x32xf32> to vector<1x32xf32>
    %c0_61 = arith.constant 0 : index
    %c0_62 = arith.constant 0 : index
    %c0_63 = arith.constant 0 : index
    %188 = vector.load %arg10[%c0_61, %c0_62, %c0_63] : memref<1x1x32xf32, #tpu.memory_space<vmem>>, vector<1x1x32xf32>
    %189 = vector.shape_cast %188 : vector<1x1x32xf32> to vector<1x32xf32>
    %cst_64 = arith.constant dense<0.000000e+00> : vector<16xf32>
    %190 = vector.multi_reduction <add>, %185, %cst_64 [1] : vector<16x32xf32> to vector<16xf32>
    %191 = vector.shape_cast %190 : vector<16xf32> to vector<16x1xf32>
    %cst_65 = arith.constant 3.200000e+01 : f32
    %192 = vector.broadcast %cst_65 : f32 to vector<16x1xf32>
    %193 = arith.divf %191, %192 : vector<16x1xf32>
    %194 = vector.broadcast %193 : vector<16x1xf32> to vector<16x32xf32>
    %195 = arith.subf %185, %194 : vector<16x32xf32>
    %196 = arith.mulf %195, %195 : vector<16x32xf32>
    %cst_66 = arith.constant dense<0.000000e+00> : vector<16xf32>
    %197 = vector.multi_reduction <add>, %196, %cst_66 [1] : vector<16x32xf32> to vector<16xf32>
    %198 = vector.shape_cast %197 : vector<16xf32> to vector<16x1xf32>
    %cst_67 = arith.constant 3.200000e+01 : f32
    %199 = vector.broadcast %cst_67 : f32 to vector<16x1xf32>
    %200 = arith.divf %198, %199 : vector<16x1xf32>
    %cst_68 = arith.constant 9.99999996E-13 : f32
    %201 = vector.broadcast %cst_68 : f32 to vector<16x1xf32>
    %202 = arith.addf %200, %201 : vector<16x1xf32>
    %203 = math.rsqrt %202 : vector<16x1xf32>
    %204 = vector.broadcast %203 : vector<16x1xf32> to vector<16x32xf32>
    %205 = arith.mulf %195, %204 : vector<16x32xf32>
    %206 = vector.broadcast %187 : vector<1x32xf32> to vector<16x32xf32>
    %207 = arith.mulf %205, %206 : vector<16x32xf32>
    %208 = vector.broadcast %189 : vector<1x32xf32> to vector<16x32xf32>
    %209 = arith.addf %207, %208 : vector<16x32xf32>
    %c0_69 = arith.constant 0 : index
    %c0_70 = arith.constant 0 : index
    %c0_71 = arith.constant 0 : index
    %210 = vector.load %arg11[%c0_69, %c0_70, %c0_71] : memref<1x32x64xf32, #tpu.memory_space<vmem>>, vector<1x32x64xf32>
    %211 = vector.shape_cast %210 : vector<1x32x64xf32> to vector<32x64xf32>
    %cst_72 = arith.constant dense<0.000000e+00> : vector<16x64xf32>
    %212 = tpu.matmul %209, %211, %cst_72 {dimension_numbers = #tpu.dot_dimension_numbers<[1], [0], [0], [1], [0, 0, 1, 1], [], []>} : vector<16x32xf32>, vector<32x64xf32>, vector<16x64xf32> -> vector<16x64xf32>
    %c0_73 = arith.constant 0 : index
    %c0_74 = arith.constant 0 : index
    %c0_75 = arith.constant 0 : index
    %213 = vector.load %arg12[%c0_73, %c0_74, %c0_75] : memref<1x1x64xf32, #tpu.memory_space<vmem>>, vector<1x1x64xf32>
    %214 = vector.shape_cast %213 : vector<1x1x64xf32> to vector<1x64xf32>
    %215 = vector.broadcast %214 : vector<1x64xf32> to vector<16x64xf32>
    %216 = arith.addf %212, %215 : vector<16x64xf32>
    %cst_76 = arith.constant 5.000000e-01 : f32
    %217 = vector.broadcast %cst_76 : f32 to vector<16x64xf32>
    %218 = arith.mulf %217, %216 : vector<16x64xf32>
    %cst_77 = arith.constant 0.707106769 : f32
    %219 = vector.broadcast %cst_77 : f32 to vector<16x64xf32>
    %220 = arith.mulf %216, %219 : vector<16x64xf32>
    %cst_78 = arith.constant 0.000000e+00 : f32
    %221 = vector.broadcast %cst_78 : f32 to vector<16x64xf32>
    %222 = arith.cmpf oge, %220, %221 : vector<16x64xf32>
    %cst_79 = arith.constant 1.000000e+00 : f32
    %cst_80 = arith.constant -1.000000e+00 : f32
    %223 = vector.broadcast %cst_79 : f32 to vector<16x64xf32>
    %224 = vector.broadcast %cst_80 : f32 to vector<16x64xf32>
    %225 = arith.select %222, %223, %224 : vector<16x64xi1>, vector<16x64xf32>
    %226 = math.absf %220 : vector<16x64xf32>
    %cst_81 = arith.constant 0.327591091 : f32
    %227 = vector.broadcast %cst_81 : f32 to vector<16x64xf32>
    %228 = arith.mulf %227, %226 : vector<16x64xf32>
    %cst_82 = arith.constant 1.000000e+00 : f32
    %229 = vector.broadcast %cst_82 : f32 to vector<16x64xf32>
    %230 = arith.addf %229, %228 : vector<16x64xf32>
    %cst_83 = arith.constant 1.000000e+00 : f32
    %231 = vector.broadcast %cst_83 : f32 to vector<16x64xf32>
    %232 = arith.divf %231, %230 : vector<16x64xf32>
    %cst_84 = arith.constant 1.06140542 : f32
    %233 = vector.broadcast %cst_84 : f32 to vector<16x64xf32>
    %234 = arith.mulf %233, %232 : vector<16x64xf32>
    %cst_85 = arith.constant -1.45315206 : f32
    %235 = vector.broadcast %cst_85 : f32 to vector<16x64xf32>
    %236 = arith.addf %234, %235 : vector<16x64xf32>
    %237 = arith.mulf %236, %232 : vector<16x64xf32>
    %cst_86 = arith.constant 1.42141378 : f32
    %238 = vector.broadcast %cst_86 : f32 to vector<16x64xf32>
    %239 = arith.addf %237, %238 : vector<16x64xf32>
    %240 = arith.mulf %239, %232 : vector<16x64xf32>
    %cst_87 = arith.constant -0.284496725 : f32
    %241 = vector.broadcast %cst_87 : f32 to vector<16x64xf32>
    %242 = arith.addf %240, %241 : vector<16x64xf32>
    %243 = arith.mulf %242, %232 : vector<16x64xf32>
    %cst_88 = arith.constant 0.254829586 : f32
    %244 = vector.broadcast %cst_88 : f32 to vector<16x64xf32>
    %245 = arith.addf %243, %244 : vector<16x64xf32>
    %246 = arith.mulf %245, %232 : vector<16x64xf32>
    %cst_89 = arith.constant 0.000000e+00 : f32
    %247 = vector.broadcast %cst_89 : f32 to vector<16x64xf32>
    %248 = arith.subf %247, %226 : vector<16x64xf32>
    %249 = arith.mulf %248, %226 : vector<16x64xf32>
    %250 = math.exp %249 : vector<16x64xf32>
    %251 = arith.mulf %246, %250 : vector<16x64xf32>
    %cst_90 = arith.constant 1.000000e+00 : f32
    %252 = vector.broadcast %cst_90 : f32 to vector<16x64xf32>
    %253 = arith.subf %252, %251 : vector<16x64xf32>
    %254 = arith.mulf %225, %253 : vector<16x64xf32>
    %cst_91 = arith.constant 1.000000e+00 : f32
    %255 = vector.broadcast %cst_91 : f32 to vector<16x64xf32>
    %256 = arith.addf %255, %254 : vector<16x64xf32>
    %257 = arith.mulf %218, %256 : vector<16x64xf32>
    %c0_92 = arith.constant 0 : index
    %c0_93 = arith.constant 0 : index
    %c0_94 = arith.constant 0 : index
    %258 = vector.load %arg13[%c0_92, %c0_93, %c0_94] : memref<1x64x32xf32, #tpu.memory_space<vmem>>, vector<1x64x32xf32>
    %259 = vector.shape_cast %258 : vector<1x64x32xf32> to vector<64x32xf32>
    %cst_95 = arith.constant dense<0.000000e+00> : vector<16x32xf32>
    %260 = tpu.matmul %257, %259, %cst_95 {dimension_numbers = #tpu.dot_dimension_numbers<[1], [0], [0], [1], [0, 0, 1, 1], [], []>} : vector<16x64xf32>, vector<64x32xf32>, vector<16x32xf32> -> vector<16x32xf32>
    %c0_96 = arith.constant 0 : index
    %c0_97 = arith.constant 0 : index
    %c0_98 = arith.constant 0 : index
    %261 = vector.load %arg14[%c0_96, %c0_97, %c0_98] : memref<1x1x32xf32, #tpu.memory_space<vmem>>, vector<1x1x32xf32>
    %262 = vector.shape_cast %261 : vector<1x1x32xf32> to vector<1x32xf32>
    %263 = vector.broadcast %262 : vector<1x32xf32> to vector<16x32xf32>
    %264 = arith.addf %260, %263 : vector<16x32xf32>
    %265 = arith.addf %264, %209 : vector<16x32xf32>
    %c0_99 = arith.constant 0 : index
    %c0_100 = arith.constant 0 : index
    %c0_101 = arith.constant 0 : index
    %266 = vector.load %arg15[%c0_99, %c0_100, %c0_101] : memref<1x1x32xf32, #tpu.memory_space<vmem>>, vector<1x1x32xf32>
    %267 = vector.shape_cast %266 : vector<1x1x32xf32> to vector<1x32xf32>
    %c0_102 = arith.constant 0 : index
    %c0_103 = arith.constant 0 : index
    %c0_104 = arith.constant 0 : index
    %268 = vector.load %arg16[%c0_102, %c0_103, %c0_104] : memref<1x1x32xf32, #tpu.memory_space<vmem>>, vector<1x1x32xf32>
    %269 = vector.shape_cast %268 : vector<1x1x32xf32> to vector<1x32xf32>
    %cst_105 = arith.constant dense<0.000000e+00> : vector<16xf32>
    %270 = vector.multi_reduction <add>, %265, %cst_105 [1] : vector<16x32xf32> to vector<16xf32>
    %271 = vector.shape_cast %270 : vector<16xf32> to vector<16x1xf32>
    %cst_106 = arith.constant 3.200000e+01 : f32
    %272 = vector.broadcast %cst_106 : f32 to vector<16x1xf32>
    %273 = arith.divf %271, %272 : vector<16x1xf32>
    %274 = vector.broadcast %273 : vector<16x1xf32> to vector<16x32xf32>
    %275 = arith.subf %265, %274 : vector<16x32xf32>
    %276 = arith.mulf %275, %275 : vector<16x32xf32>
    %cst_107 = arith.constant dense<0.000000e+00> : vector<16xf32>
    %277 = vector.multi_reduction <add>, %276, %cst_107 [1] : vector<16x32xf32> to vector<16xf32>
    %278 = vector.shape_cast %277 : vector<16xf32> to vector<16x1xf32>
    %cst_108 = arith.constant 3.200000e+01 : f32
    %279 = vector.broadcast %cst_108 : f32 to vector<16x1xf32>
    %280 = arith.divf %278, %279 : vector<16x1xf32>
    %cst_109 = arith.constant 9.99999996E-13 : f32
    %281 = vector.broadcast %cst_109 : f32 to vector<16x1xf32>
    %282 = arith.addf %280, %281 : vector<16x1xf32>
    %283 = math.rsqrt %282 : vector<16x1xf32>
    %284 = vector.broadcast %283 : vector<16x1xf32> to vector<16x32xf32>
    %285 = arith.mulf %275, %284 : vector<16x32xf32>
    %286 = vector.broadcast %267 : vector<1x32xf32> to vector<16x32xf32>
    %287 = arith.mulf %285, %286 : vector<16x32xf32>
    %288 = vector.broadcast %269 : vector<1x32xf32> to vector<16x32xf32>
    %289 = arith.addf %287, %288 : vector<16x32xf32>
    %c0_110 = arith.constant 0 : index
    %c0_111 = arith.constant 0 : index
    %290 = vector.load %arg22[%c0_110, %c0_111] : memref<16x32xf32, #tpu.memory_space<vmem>>, vector<16x32xf32>
    tpu.vector_store %arg22[%c0_110, %c0_111], %289 {strides = array<i32>} : memref<16x32xf32, #tpu.memory_space<vmem>>, vector<16x32xf32>,
    %c1_i32 = arith.constant 1 : i32
    %291 = arith.cmpi eq, %arg0, %c1_i32 : i32
    %292 = arith.extui %291 : i1 to i32
    %c0_i32_112 = arith.constant 0 : i32
    %293 = arith.cmpi ne, %292, %c0_i32_112 : i32
    scf.if %293 {
      %294 = vector.extract_strided_slice %289 {offsets = [0, 0], sizes = [1, 32], strides = [1, 1]} : vector<16x32xf32> to vector<1x32xf32>
      %295 = vector.extract_strided_slice %289 {offsets = [8, 0], sizes = [1, 32], strides = [1, 1]} : vector<16x32xf32> to vector<1x32xf32>
      %296 = tpu.concatenate %294, %295 in 0 : vector<1x32xf32>, vector<1x32xf32> -> vector<2x32xf32>
      %c0_113 = arith.constant 0 : index
      %c0_114 = arith.constant 0 : index
      %297 = vector.load %arg17[%c0_113, %c0_114] : memref<32x32xf32, #tpu.memory_space<vmem>>, vector<32x32xf32>
      %cst_115 = arith.constant dense<0.000000e+00> : vector<2x32xf32>
      %298 = tpu.matmul %296, %297, %cst_115 {dimension_numbers = #tpu.dot_dimension_numbers<[1], [0], [0], [1], [0, 0, 1, 1], [], []>} : vector<2x32xf32>, vector<32x32xf32>, vector<2x32xf32> -> vector<2x32xf32>
      %c0_116 = arith.constant 0 : index
      %c0_117 = arith.constant 0 : index
      %299 = vector.load %arg18[%c0_116, %c0_117] : memref<1x32xf32, #tpu.memory_space<vmem>>, vector<1x32xf32>
      %300 = vector.broadcast %299 : vector<1x32xf32> to vector<2x32xf32>
      %301 = arith.addf %298, %300 : vector<2x32xf32>
      %302 = math.tanh %301 : vector<2x32xf32>
      %c0_118 = arith.constant 0 : index
      %c0_119 = arith.constant 0 : index
      %303 = vector.load %arg19[%c0_118, %c0_119] : memref<32x16xf32, #tpu.memory_space<vmem>>, vector<32x16xf32>
      %cst_120 = arith.constant dense<0.000000e+00> : vector<2x16xf32>
      %304 = tpu.matmul %302, %303, %cst_120 {dimension_numbers = #tpu.dot_dimension_numbers<[1], [0], [0], [1], [0, 0, 1, 1], [], []>} : vector<2x32xf32>, vector<32x16xf32>, vector<2x16xf32> -> vector<2x16xf32>
      %c0_121 = arith.constant 0 : index
      %c0_122 = arith.constant 0 : index
      %305 = vector.load %arg20[%c0_121, %c0_122] : memref<1x16xf32, #tpu.memory_space<vmem>>, vector<1x16xf32>
      %306 = vector.broadcast %305 : vector<1x16xf32> to vector<2x16xf32>
      %307 = arith.addf %304, %306 : vector<2x16xf32>
      %c0_123 = arith.constant 0 : index
      %c0_124 = arith.constant 0 : index
      %308 = vector.load %arg21[%c0_123, %c0_124] : memref<2x16xf32, #tpu.memory_space<vmem>>, vector<2x16xf32>
      tpu.vector_store %arg21[%c0_123, %c0_124], %307 {strides = array<i32>} : memref<2x16xf32, #tpu.memory_space<vmem>>, vector<2x16xf32>,
    } else {
    }
    return
  }
  func.func @transform_0(%arg0: i32) -> (i32, i32) {
    %c0_i32 = arith.constant 0 : i32
    %c0_i32_0 = arith.constant 0 : i32
    %c0_i32_1 = arith.constant 0 : i32
    return %c0_i32, %c0_i32_0 : i32, i32
  }
  func.func @transform_1(%arg0: i32) -> (i32, i32) {
    %c0_i32 = arith.constant 0 : i32
    %c0_i32_0 = arith.constant 0 : i32
    %c0_i32_1 = arith.constant 0 : i32
    return %c0_i32, %c0_i32_0 : i32, i32
  }
  func.func @transform_2(%arg0: i32) -> (i32, i32) {
    %c0_i32 = arith.constant 0 : i32
    %c0_i32_0 = arith.constant 0 : i32
    %c0_i32_1 = arith.constant 0 : i32
    return %c0_i32, %c0_i32_0 : i32, i32
  }
  func.func @transform_3(%arg0: i32) -> (i32, i32) {
    %c0_i32 = arith.constant 0 : i32
    %c0_i32_0 = arith.constant 0 : i32
    %c0_i32_1 = arith.constant 0 : i32
    return %c0_i32, %c0_i32_0 : i32, i32
  }
  func.func @transform_4(%arg0: i32) -> (i32, i32, i32) {
    %c0_i32 = arith.constant 0 : i32
    %c0_i32_0 = arith.constant 0 : i32
    %c0_i32_1 = arith.constant 0 : i32
    return %arg0, %c0_i32, %c0_i32_0 : i32, i32, i32
  }
  func.func @transform_5(%arg0: i32) -> (i32, i32, i32) {
    %c0_i32 = arith.constant 0 : i32
    %c0_i32_0 = arith.constant 0 : i32
    %c0_i32_1 = arith.constant 0 : i32
    return %arg0, %c0_i32, %c0_i32_0 : i32, i32, i32
  }
  func.func @transform_6(%arg0: i32) -> (i32, i32, i32) {
    %c0_i32 = arith.constant 0 : i32
    %c0_i32_0 = arith.constant 0 : i32
    %c0_i32_1 = arith.constant 0 : i32
    return %arg0, %c0_i32, %c0_i32_0 : i32, i32, i32
  }
  func.func @transform_7(%arg0: i32) -> (i32, i32, i32) {
    %c0_i32 = arith.constant 0 : i32
    %c0_i32_0 = arith.constant 0 : i32
    %c0_i32_1 = arith.constant 0 : i32
    return %arg0, %c0_i32, %c0_i32_0 : i32, i32, i32
  }
  func.func @transform_8(%arg0: i32) -> (i32, i32, i32) {
    %c0_i32 = arith.constant 0 : i32
    %c0_i32_0 = arith.constant 0 : i32
    %c0_i32_1 = arith.constant 0 : i32
    return %arg0, %c0_i32, %c0_i32_0 : i32, i32, i32
  }
  func.func @transform_9(%arg0: i32) -> (i32, i32, i32) {
    %c0_i32 = arith.constant 0 : i32
    %c0_i32_0 = arith.constant 0 : i32
    %c0_i32_1 = arith.constant 0 : i32
    return %arg0, %c0_i32, %c0_i32_0 : i32, i32, i32
  }
  func.func @transform_10(%arg0: i32) -> (i32, i32, i32) {
    %c0_i32 = arith.constant 0 : i32
    %c0_i32_0 = arith.constant 0 : i32
    %c0_i32_1 = arith.constant 0 : i32
    return %arg0, %c0_i32, %c0_i32_0 : i32, i32, i32
  }
  func.func @transform_11(%arg0: i32) -> (i32, i32, i32) {
    %c0_i32 = arith.constant 0 : i32
    %c0_i32_0 = arith.constant 0 : i32
    %c0_i32_1 = arith.constant 0 : i32
    return %arg0, %c0_i32, %c0_i32_0 : i32, i32, i32
  }
  func.func @transform_12(%arg0: i32) -> (i32, i32, i32) {
    %c0_i32 = arith.constant 0 : i32
    %c0_i32_0 = arith.constant 0 : i32
    %c0_i32_1 = arith.constant 0 : i32
    return %arg0, %c0_i32, %c0_i32_0 : i32, i32, i32
  }
  func.func @transform_13(%arg0: i32) -> (i32, i32, i32) {
    %c0_i32 = arith.constant 0 : i32
    %c0_i32_0 = arith.constant 0 : i32
    %c0_i32_1 = arith.constant 0 : i32
    return %arg0, %c0_i32, %c0_i32_0 : i32, i32, i32
  }
  func.func @transform_14(%arg0: i32) -> (i32, i32, i32) {
    %c0_i32 = arith.constant 0 : i32
    %c0_i32_0 = arith.constant 0 : i32
    %c0_i32_1 = arith.constant 0 : i32
    return %arg0, %c0_i32, %c0_i32_0 : i32, i32, i32
  }
  func.func @transform_15(%arg0: i32) -> (i32, i32, i32) {
    %c0_i32 = arith.constant 0 : i32
    %c0_i32_0 = arith.constant 0 : i32
    %c0_i32_1 = arith.constant 0 : i32
    return %arg0, %c0_i32, %c0_i32_0 : i32, i32, i32
  }
  func.func @transform_16(%arg0: i32) -> (i32, i32) {
    %c0_i32 = arith.constant 0 : i32
    %c0_i32_0 = arith.constant 0 : i32
    %c0_i32_1 = arith.constant 0 : i32
    return %c0_i32, %c0_i32_0 : i32, i32
  }
  func.func @transform_17(%arg0: i32) -> (i32, i32) {
    %c0_i32 = arith.constant 0 : i32
    %c0_i32_0 = arith.constant 0 : i32
    %c0_i32_1 = arith.constant 0 : i32
    return %c0_i32, %c0_i32_0 : i32, i32
  }
  func.func @transform_18(%arg0: i32) -> (i32, i32) {
    %c0_i32 = arith.constant 0 : i32
    %c0_i32_0 = arith.constant 0 : i32
    %c0_i32_1 = arith.constant 0 : i32
    return %c0_i32, %c0_i32_0 : i32, i32
  }
  func.func @transform_19(%arg0: i32) -> (i32, i32) {
    %c0_i32 = arith.constant 0 : i32
    %c0_i32_0 = arith.constant 0 : i32
    %c0_i32_1 = arith.constant 0 : i32
    return %c0_i32, %c0_i32_0 : i32, i32
  }
  func.func @transform_20(%arg0: i32) -> (i32, i32) {
    %c0_i32 = arith.constant 0 : i32
    %c0_i32_0 = arith.constant 0 : i32
    %c0_i32_1 = arith.constant 0 : i32
    return %c0_i32, %c0_i32_0 : i32, i32
  }
}

</mosaic_0001>

<bundles_post_ra>
// kernel: _forward.1
= control target key start
LH: loop header
LB: loop body
LE: loop exit
PB: predicated region body
PF: predicated region fallthrough
CT: control target
= control target key end

     0   :  { %s4066_s0 = inlined_call_operand.vmem [shape: f32[16,32], index: 0, kind: input, shape index: {}]   ;;  %s4067_s1 = inlined_call_operand.vmem [shape: f32[2,8], index: 1, kind: input, shape index: {}]   ;;  %s4068_s2 = inlined_call_operand.vmem [shape: f32[1,32], index: 2, kind: input, shape index: {}]   ;;  %s4069_s3 = inlined_call_operand.vmem [shape: f32[1,32], index: 3, kind: input, shape index: {}]   ;;  %s4070_s4 = inlined_call_operand.vmem [shape: f32[2,32,96], index: 4, kind: input, shape index: {}]   ;;  %s4071_s5 = inlined_call_operand.vmem [shape: f32[2,1,96], index: 5, kind: input, shape index: {}]   ;;  %s4072_s6 = inlined_call_operand.vmem [shape: f32[2,32,32], index: 6, kind: input, shape index: {}]   ;;  %s4073_s7 = inlined_call_operand.vmem [shape: f32[2,1,32], index: 7, kind: input, shape index: {}]   ;;  %s4074_s8 = inlined_call_operand.vmem [shape: f32[2,1,32], index: 8, kind: input, shape index: {}]   ;;  %s4075_s9 = inlined_call_operand.vmem [shape: f32[2,1,32], index: 9, kind: input, shape index: {}]   ;;  %s4076_s10 = inlined_call_operand.vmem [shape: f32[2,32,64], index: 10, kind: input, shape index: {}]   ;;  %s4077_s11 = inlined_call_operand.vmem [shape: f32[2,1,64], index: 11, kind: input, shape index: {}]   ;;  %s4078_s12 = inlined_call_operand.vmem [shape: f32[2,64,32], index: 12, kind: input, shape index: {}]   ;;  %s4079_s13 = inlined_call_operand.vmem [shape: f32[2,1,32], index: 13, kind: input, shape index: {}]   ;;  %s4080_s14 = inlined_call_operand.vmem [shape: f32[2,1,32], index: 14, kind: input, shape index: {}]   ;;  %s4081_s15 = inlined_call_operand.vmem [shape: f32[2,1,32], index: 15, kind: input, shape index: {}]   ;;  %s4082_s16 = inlined_call_operand.vmem [shape: f32[32,32], index: 16, kind: input, shape index: {}]   ;;  %s4083_s17 = inlined_call_operand.vmem [shape: f32[1,32], index: 17, kind: input, shape index: {}]   ;;  %s4084_s18 = inlined_call_operand.vmem [shape: f32[32,16], index: 18, kind: input, shape index: {}]   ;;  %s4085_s19 = inlined_call_operand.vmem [shape: f32[1,16], index: 19, kind: input, shape index: {}]   ;;  %s4086_s20 = inlined_call_operand.hbm [shape: f32[2,16], index: 20, kind: output, shape index: {}]  }
   0x1   :  { %4093 = sst [smem:[#allocation7_spill]] %s4066_s0 }
   0x2   :  { %4094 = sst [smem:[#allocation8_spill]] %s4067_s1 }
   0x3   :  { %4095 = sst [smem:[#allocation9_spill]] %s4068_s2 }
   0x4   :  { %4096 = sst [smem:[#allocation10_spill]] %s4069_s3 }
   0x5   :  { %4097 = sst [smem:[#allocation11_spill]] %s4070_s4 }
   0x6   :  { %4098 = sst [smem:[#allocation12_spill]] %s4072_s6 }
   0x7   :  { %4099 = sst [smem:[#allocation13_spill]] %s4082_s16 }
   0x8   :  { %4100 = sst [smem:[#allocation14_spill]] %s4083_s17 }
   0x9   :  { %4101 = sst [smem:[#allocation15_spill]] %s4084_s18 }
   0xa   :  { %4102 = sst [smem:[#allocation16_spill]] %s4085_s19 }
   0xb   :  { %4103 = sst [smem:[#allocation17_spill]] %s4086_s20 }
   0xc   :  { %25 = vsyncpa [#allocation4], 0  ;;  %s3677_s1 = smov 0  }
   0xd LB: > { %4104 = sst [smem:[#allocation6_spill]] %s3549_s1  ;;  %s3683_s22 = sadd.s32 4294967295, %s3549_s1   ;;  %s3549_s1 = sphi %s3677_s1, %s31_s1  }
   0xe   : > { %p3081_p0 = scmp.ge.s32.totalorder %s3549_s1, 1  ;;  %p652_p1 = scmp.lt.s32.totalorder %s3549_s1, 3 }
  0x10   : > { %p653_p2 = pnand %p3081_p0, %p652_p1 }
  0x11   : > { %p744_p3 = scmp.lt.s32.totalorder (!%p653_p2), %s3683_s22, 1  ;;  %s4105_s28 = sld [smem:[#allocation11_spill]] (!%p653_p2) }
  0x12   : > { %656 = sbr.rel (%p653_p2) target bundleno = 3426 (0xd62), region = 100  ;;  %s4106_s6 = sld [smem:[#allocation12_spill]] (!%p653_p2) }
  0x13   : > { %p3090_p4 = scmp.ne.s32.totalorder (!%p653_p2), %s3683_s22, 0 }
  0x19   : > { %s3689_s23 = scalar_select %p744_p3, %s3683_s22, 1 }
  0x1a   : > { %791 = sbr.rel (%p3090_p4) target bundleno = 351 (0x15f), region = 104  ;;  %s4107_s1 = sld [smem:[#allocation7_spill]] (!%p3090_p4)  ;;  %vm796_vm0 = vcmask (!%p3090_p4), 261120  }
  0x1b   : > { %s3144_s24 = sshll.u32 %s3689_s23, 5  ;;  %s3147_s16 = sshll.u32 %s3689_s23, 6 }
  0x1c   : > { %s3699_s4 = scalar_lea.vmem %s4105_s28, %s3144_s24  ;;  %s3704_s0 = scalar_lea.vmem %s4106_s6, %s3144_s24 }
  0x1d   : > { %s3721_s28 = scalar_lea.vmem %s4076_s10, %s3144_s24  ;;  %s3731_s20 = scalar_lea.vmem %s4078_s12, %s3147_s16 }
  0x1e   : > { %s781_s2 = scalar_lea.vmem %s4079_s13, %s3689_s23  ;;  %s784_s26 = scalar_lea.vmem %s4080_s14, %s3689_s23 }
  0x1f   : > { %s787_s18 = scalar_lea.vmem %s4081_s15, %s3689_s23  ;;  %s4109_s17 = sld [smem:[#allocation9_spill]] (!%p3090_p4) }
  0x20   : > { %s4108_s21 = smov (!%p3090_p4), %s4107_s1  ;;  %v792_v0 = vld [vmem:[%s4107_s1] sm:$0xff] (!%p3090_p4)  ;;  %s4110_s24 = sld [smem:[#allocation10_spill]] (!%p3090_p4) }
  0x21   : > { %v793_v1 = vld [vmem:[%s4108_s21 + $0x8] sm:$0xff]  ;;  %v797_v2 = vsel %vm796_vm0, %v792_v0, 0.0 }
  0x22   : > { %798 = vadd.xlane.f32.xlu0 %v797_v2  ;;  %v800_v3 = vsel %vm796_vm0, %v793_v1, 0.0 }
  0x25   : > { %v3091_v21 = vld [vmem:[%s4109_s17] ss:$0 sm:$0xff] }
  0x26   : > { %801 = vadd.xlane.f32.xlu0 %v800_v3  ;;  %v3092_v23 = vld [vmem:[%s4110_s24] ss:$0 sm:$0xff] }
  0xaf   : > { %v799_v4 = vpop.xlane.xlu0 %798 }
  0xb0   : > { %v804_v5 = vmul.f32 0.03125, %v799_v4 }
  0xb2   : > { %v806_v6 = vsub.f32 %v792_v0, %v804_v5 }
  0xb3   : > { %v802_v7 = vpop.xlane.xlu0 %801 }
  0xb4   : > { %v805_v8 = vmul.f32 0.03125, %v802_v7  ;;  %v808_v9 = vmul.f32 %v806_v6, %v806_v6 }
  0xb6   : > { %v807_v10 = vsub.f32 %v793_v1, %v805_v8  ;;  %v810_v11 = vsel %vm796_vm0, %v808_v9, 0.0 }
  0xb7   : > { %811 = vadd.xlane.f32.xlu1 %v810_v11 }
  0xb8   : > { %v809_v12 = vmul.f32 %v807_v10, %v807_v10 }
  0xba   : > { %v813_v13 = vsel %vm796_vm0, %v809_v12, 0.0 }
  0xbb   : > { %814 = vadd.xlane.f32.xlu1 %v813_v13 }
 0x144   : > { %v812_v14 = vpop.xlane.xlu1 %811 }
 0x145   : > { %v816_v15 = vmul.f32 0.03125, %v812_v14 }
 0x147   : > { %v818_v16 = vadd.f32 1e-12, %v816_v15 }
 0x148   : > { %v815_v17 = vpop.xlane.xlu1 %814 }
 0x149   : > { %3459 = vrsqrt.f32 %v818_v16  ;;  %v817_v18 = vmul.f32 0.03125, %v815_v17 }
 0x14b   : > { %v819_v19 = vadd.f32 1e-12, %v817_v18 }
 0x14d   : > { %3461 = vrsqrt.f32 %v819_v19 }
 0x153   : > { %v3460_v20 = vpop.eup %3459 }
 0x154   : > { %v822_v22 = vmul.f32 %v3460_v20, %v806_v6 }
 0x156   : > { %v830_v24 = vmul.f32 %v3091_v21, %v822_v22 }
 0x157   : > { %v3462_v25 = vpop.eup %3461 }
 0x158   : > { %v838_v26 = vadd.f32 %v3092_v23, %v830_v24  ;;  %v823_v27 = vmul.f32 %v3462_v25, %v807_v10 }
 0x15a   : > { %840 = vst.msk [vmem:[#allocation2] sm:$0xff] %vm796_vm0, %v838_v26  ;;  %v831_v28 = vmul.f32 %v3091_v21, %v823_v27 }
 0x15c   : > { %v839_v29 = vadd.f32 %v3092_v23, %v831_v28 }
 0x15e   : > { %841 = vst.msk [vmem:[#allocation2 + $0x8] sm:$0xff] %vm796_vm0, %v839_v29 }
 0x15f PF: > { %v844_v30 = vld [vmem:[%s3699_s4] sm:$0xff]  ;;  %v845_v31 = vld [vmem:[%s3699_s4 + $0x8] sm:$0xff]  ;;  %v846_v32 = vld [vmem:[%s3699_s4 + $0x10] sm:$0xff]  ;;  %vm855_vm1 = vcmask 261120   ;;  %v3551_v38 = vmov 0.0   ;;  %vm3552_vm2 = vmmov 0   ;;  %s4111_s29 = scalar_lea.vmem %s4071_s5, %s3689_s23 }
 0x160   : > { %v3372_v33 = vpack.c.bf16 %v845_v31, %v844_v30  ;;  %v847_v34 = vld [vmem:[%s3699_s4 + $0x18] sm:$0xff]  ;;  %3239 = vmatprep.subr.mxu0 %v3551_v38  ;;  %3241 = vmatprep.mubr.msk.f32.mxu0 %vm3552_vm2, %v3551_v38  ;;  %v3093_v39 = vld [vmem:[%s4111_s29] ss:$0 sm:$0xff]  ;;  %s3553_s30 = smov 120   ;;  %s3554_s1 = smov 96   ;;  %vm941_vm3 = vcmask 64512  }
 0x161   : > { %v3768_v35 = vld [vmem:[#allocation2] sm:$0xff]  ;;  %v3376_v36 = vpack.c.bf16 %v847_v34, %v846_v32  ;;  %s3555_s16 = smov 80   ;;  %s3556_s6 = smov 88   ;;  %vm1623_vm4 = vcmask 130048   ;;  %vm1625_vm5 = vcmask 195584   ;;  %vm2614_vm8 = vcmask 523264  }
 0x162   : > { %3226 = vmatprep.mubr.msk.f32.mxu1 %vm855_vm1, %v3768_v35  ;;  %3373 = vmatprep.subr.bf16.mxu1 %v3372_v33  ;;  %s3557_s3 = smov 72   ;;  %s3558_s17 = smov 112  }
 0x163   : > { %3375 = vmatpush3.bf16.msra.mxu1 %v3372_v33  ;;  %s3559_s19 = smov 104   ;;  %s3560_s25 = smov 56  }
 0x164   : > { %3377 = vmatprep.subr.bf16.mxu1 %v3376_v36  ;;  %s3561_s24 = smov 64   ;;  %s4112_s29 = sld [smem:[#allocation8_spill]] }
 0x165   : > { %v3772_v37 = vld [vmem:[#allocation2 + $0x8] sm:$0xff]  ;;  %p3135_p5 = scmp.ne.s32.totalorder %s3683_s22, 1 }
 0x166   : > { %s4117_s27 = sld [smem:[#allocation13_spill]] (!%p3135_p5)  ;;  %vm3569_vm9 = vmmov (!%p3135_p5), 0   ;;  %vm2751_vm10 = vcmask (!%p3135_p5), 1040384   ;;  %vm2922_vm11 = vcmask (!%p3135_p5), 123904  }
 0x167   : > { %3379 = vmatpush3.bf16.msra.mxu1 %v3376_v36 }
 0x168   : > { %3229 = vmatprep.subr.mxu1 %v3551_v38 }
 0x16a   : > { %3227 = vmatmul.mubr.msk.f32.vlgmr.msra.gmra.mrb[0].mxu1 %vm855_vm1, %v3772_v37  ;;  %v3098_v60 = vld [vmem:[%s4112_s29] ss:$0 sm:$0xff]  ;;  %v3111_v16 = vld [vmem:[%s4112_s29 + $0x1] ss:$0 sm:$0xff] }
 0x16b   : > { %3231 = vmatprep.mubr.msk.f32.mxu1 %vm3552_vm2, %v3551_v38 }
 0x23d   : > { %v3228_v40 = vpop.f32.mrb[0].mxu1 }
 0x23e   : > { %v928_v41 = vpop.f32.mrb[1].mxu1  ;;  %v3795_v43 = vadd.f32 %v3228_v40, %v3093_v39 }
 0x23f   : > { %v3787_v42 = vadd.f32 %v3093_v39, %v928_v41 }
 0x241   : > { %1109 = vrot.lane.b32.xlu1 %v3787_v42, %s3553_s30  ;;  %939 = vrot.lane.b32.xlu0 %v3787_v42, %s3554_s1 }
 0x245   : > { %1278 = vrot.lane.b32.xlu1 %v3787_v42, %s3555_s16  ;;  %1111 = vrot.lane.b32.xlu0 %v3787_v42, %s3556_s6 }
 0x249   : > { %1445 = vrot.lane.b32.xlu1 %v3787_v42, %s3557_s3  ;;  %1276 = vrot.lane.b32.xlu0 %v3787_v42, %s3558_s17 }
 0x24d   : > { %1629 = vrot.lane.b32.xlu1 %v3795_v43, %s3554_s1  ;;  %1443 = vrot.lane.b32.xlu0 %v3787_v42, %s3559_s19 }
 0x251   : > { %1798 = vrot.lane.b32.xlu1 %v3795_v43, %s3553_s30  ;;  %1800 = vrot.lane.b32.xlu0 %v3795_v43, %s3556_s6  ;;  %s3563_s6 = smov 48   ;;  %s4114_s30 = scalar_lea.vmem %s4074_s8, %s3689_s23 }
 0x255   : > { %1965 = vrot.lane.b32.xlu1 %v3795_v43, %s3558_s17  ;;  %1967 = vrot.lane.b32.xlu0 %v3795_v43, %s3555_s16  ;;  %s3562_s16 = smov 40   ;;  %s3565_s17 = smov 16  }
 0x259   : > { %2132 = vrot.lane.b32.xlu1 %v3795_v43, %s3559_s19  ;;  %2134 = vrot.lane.b32.xlu0 %v3795_v43, %s3557_s3  ;;  %s3564_s3 = smov 8   ;;  %s3566_s19 = smov 24  }
 0x25d   : > { %1200 = vrot.lane.b32.xlu1 %v3787_v42, %s3560_s25  ;;  %1033 = vrot.lane.b32.xlu0 %v3787_v42, %s3561_s24 }
 0x2b3   : > { %v1110_v44 = vpop.permute.xlu1 %1109  ;;  %v940_v45 = vpop.permute.xlu0 %939 }
 0x2b4   : > { %3230 = vmatpush3.xpose.msk.msra.mxu1 %vm941_vm3, %v940_v45 }
 0x2b5   : > { %3234 = vmatprep.subr.mxu1 %v3551_v38 }
 0x2b7   : > { %v1279_v46 = vpop.permute.xlu1 %1278  ;;  %3232 = vmatmul.mubr.msk.f32.vlgmr.msra.gmra.mrb[2].mxu1 %vm941_vm3, %v3787_v42  ;;  %v1112_v47 = vpop.permute.xlu0 %1111 }
 0x2b8   : > { %3240 = vmatpush3.xpose.msk.msra.mxu0 %vm941_vm3, %v1112_v47  ;;  %3236 = vmatprep.mubr.msk.f32.mxu1 %vm3552_vm2, %v3551_v38 }
 0x2b9   : > { %3249 = vmatprep.subr.mxu0 %v3551_v38 }
 0x2bb   : > { %v1446_v48 = vpop.permute.xlu1 %1445  ;;  %3242 = vmatmul.mubr.msk.f32.vlgmr.msra.gmra.mrb[0].mxu0 %vm941_vm3, %v1110_v44  ;;  %v1277_v49 = vpop.permute.xlu0 %1276 }
 0x2bc   : > { %3250 = vmatpush3.xpose.msk.msra.mxu0 %vm941_vm3, %v1279_v46  ;;  %3251 = vmatprep.mubr.msk.f32.mxu0 %vm3552_vm2, %v3551_v38 }
 0x2bd   : > { %3259 = vmatprep.subr.mxu0 %v3551_v38 }
 0x2bf   : > { %3252 = vmatmul.mubr.msk.f32.vlgmr.msra.gmra.mrb[2].mxu0 %vm941_vm3, %v1277_v49  ;;  %v1444_v50 = vpop.permute.xlu0 %1443  ;;  %v1630_v51 = vpop.permute.xlu1 %1629 }
 0x2c0   : > { %3260 = vmatpush3.xpose.msk.msra.mxu0 %vm941_vm3, %v1446_v48  ;;  %3261 = vmatprep.mubr.msk.f32.mxu0 %vm3552_vm2, %v3551_v38 }
 0x2c1   : > { %3269 = vmatprep.subr.mxu0 %v3551_v38 }
 0x2c3   : > { %3262 = vmatmul.mubr.msk.f32.vlgmr.msra.gmra.mrb[4].mxu0 %vm941_vm3, %v1444_v50  ;;  %v1801_v52 = vpop.permute.xlu0 %1800  ;;  %v1799_v53 = vpop.permute.xlu1 %1798 }
 0x2c4   : > { %3270 = vmatpush3.xpose.msk.msra.mxu0 %vm941_vm3, %v1630_v51  ;;  %3271 = vmatprep.mubr.msk.f32.mxu0 %vm3552_vm2, %v3551_v38 }
 0x2c5   : > { %3279 = vmatprep.subr.mxu0 %v3551_v38 }
 0x2c7   : > { %3272 = vmatmul.mubr.msk.f32.vlgmr.msra.gmra.mrb[6].mxu0 %vm941_vm3, %v3795_v43  ;;  %v1968_v54 = vpop.permute.xlu0 %1967  ;;  %v1966_v56 = vpop.permute.xlu1 %1965 }
 0x2c8   : > { %3280 = vmatpush3.xpose.msk.msra.mxu0 %vm941_vm3, %v1801_v52  ;;  %3281 = vmatprep.mubr.msk.f32.mxu0 %vm3552_vm2, %v3551_v38 }
 0x2c9   : > { %3289 = vmatprep.subr.mxu0 %v3551_v38 }
 0x2cb   : > { %3282 = vmatmul.mubr.msk.f32.vlgmr.msra.gmra.mrb[8].mxu0 %vm941_vm3, %v1799_v53  ;;  %v2135_v55 = vpop.permute.xlu0 %2134  ;;  %v2133_v58 = vpop.permute.xlu1 %2132 }
 0x2cc   : > { %3290 = vmatpush3.xpose.msk.msra.mxu0 %vm941_vm3, %v1968_v54  ;;  %3291 = vmatprep.mubr.msk.f32.mxu0 %vm3552_vm2, %v3551_v38 }
 0x2cd   : > { %3299 = vmatprep.subr.mxu0 %v3551_v38 }
 0x2cf   : > { %3292 = vmatmul.mubr.msk.f32.vlgmr.msra.gmra.mrb[10].mxu0 %vm941_vm3, %v1966_v56  ;;  %v1034_v57 = vpop.permute.xlu0 %1033  ;;  %v3867_v40 = vpop.permute.xlu1 %1200 }
 0x2d0   : > { %3235 = vmatpush3.msra.mxu1 %v1034_v57  ;;  %3300 = vmatpush3.xpose.msk.msra.mxu0 %vm941_vm3, %v2135_v55 }
 0x2d1   : > { %3301 = vmatprep.mubr.msk.f32.mxu0 %vm3552_vm2, %v3551_v38  ;;  %3244 = vmatprep.subr.mxu1 %v3551_v38 }
 0x2d3   : > { %3302 = vmatmul.mubr.msk.f32.vlgmr.msra.gmra.mrb[12].mxu0 %vm941_vm3, %v2133_v58 }
 0x38a   : > { %v1012_v59 = vpop.f32.mrb[2].mxu1 }
 0x38b   : > { %v1016_v61 = vmul.f32 0.35355338, %v1012_v59  ;;  %v3233_v62 = vpop.f32.mrb[3].mxu1 }
 0x38d   : > { %v1021_v63 = vadd.f32 %v3098_v60, %v1016_v61 }
 0x38e   : > { %v1183_v0 = vpop.f32.mrb[0].mxu0 }
 0x38f   : > { %v1187_v1 = vmul.f32 0.35355338, %v1183_v0  ;;  %v3243_v2 = vpop.f32.mrb[1].mxu0  ;;  %v1022_v3 = vsel %vm941_vm3, %v1021_v63, -inf }
 0x390   : > { %1023 = vmax.xlane.f32.xlu0 %v1022_v3 }
 0x391   : > { %v1188_v4 = vadd.f32 %v3098_v60, %v1187_v1 }
 0x392   : > { %v1350_v5 = vpop.f32.mrb[2].mxu0 }
 0x393   : > { %v1354_v6 = vmul.f32 0.35355338, %v1350_v5  ;;  %v3253_v7 = vpop.f32.mrb[3].mxu0  ;;  %v1189_v8 = vsel %vm941_vm3, %v1188_v4, -inf }
 0x394   : > { %1190 = vmax.xlane.f32.xlu1 %v1189_v8 }
 0x395   : > { %v1355_v9 = vadd.f32 %v3098_v60, %v1354_v6 }
 0x396   : > { %v1517_v10 = vpop.f32.mrb[4].mxu0 }
 0x397   : > { %v1521_v11 = vmul.f32 0.35355338, %v1517_v10  ;;  %v3263_v12 = vpop.f32.mrb[5].mxu0  ;;  %v1356_v13 = vsel %vm941_vm3, %v1355_v9, -inf }
 0x398   : > { %1357 = vmax.xlane.f32.xlu0 %v1356_v13 }
 0x399   : > { %v1522_v14 = vadd.f32 %v3098_v60, %v1521_v11 }
 0x39a   : > { %v1701_v15 = vpop.f32.mrb[6].mxu0 }
 0x39b   : > { %v1705_v17 = vmul.f32 0.35355338, %v1701_v15  ;;  %v3273_v18 = vpop.f32.mrb[7].mxu0  ;;  %v1523_v19 = vsel %vm941_vm3, %v1522_v14, -inf }
 0x39c   : > { %1524 = vmax.xlane.f32.xlu0 %v1523_v19 }
 0x39d   : > { %v1710_v20 = vadd.f32 %v3111_v16, %v1705_v17 }
 0x39e   : > { %v1872_v21 = vpop.f32.mrb[8].mxu0 }
 0x39f   : > { %v1876_v22 = vmul.f32 0.35355338, %v1872_v21  ;;  %v3283_v23 = vpop.f32.mrb[9].mxu0  ;;  %v1711_v24 = vsel %vm941_vm3, %v1710_v20, -inf }
 0x3a0   : > { %1712 = vmax.xlane.f32.xlu1 %v1711_v24 }
 0x3a1   : > { %v1877_v25 = vadd.f32 %v3111_v16, %v1876_v22 }
 0x3a2   : > { %v2039_v26 = vpop.f32.mrb[10].mxu0 }
 0x3a3   : > { %v2043_v27 = vmul.f32 0.35355338, %v2039_v26  ;;  %v3293_v28 = vpop.f32.mrb[11].mxu0  ;;  %v1878_v29 = vsel %vm941_vm3, %v1877_v25, -inf }
 0x3a4   : > { %1879 = vmax.xlane.f32.xlu0 %v1878_v29 }
 0x3a5   : > { %v2044_v30 = vadd.f32 %v3111_v16, %v2043_v27 }
 0x3a6   : > { %v2206_v31 = vpop.f32.mrb[12].mxu0 }
 0x3a7   : > { %v2210_v32 = vmul.f32 0.35355338, %v2206_v31  ;;  %v3303_v33 = vpop.f32.mrb[13].mxu0  ;;  %v2045_v34 = vsel %vm941_vm3, %v2044_v30, -inf }
 0x3a8   : > { %2046 = vmax.xlane.f32.xlu1 %v2045_v34 }
 0x3a9   : > { %v2211_v36 = vadd.f32 %v3111_v16, %v2210_v32 }
 0x3ab   : > { %v2212_v39 = vsel %vm941_vm3, %v2211_v36, -inf }
 0x3ac   : > { %2213 = vmax.xlane.f32.xlu0 %v2212_v39 }
 0x3b9   : > { %1534 = vrot.lane.b32.xlu1 %v3787_v42, %s3562_s16 }
 0x3c2   : > { %1367 = vrot.lane.b32.xlu0 %v3787_v42, %s3563_s6 }
 0x41d   : > { %v1024_v41 = vpop.xlane.xlu0 %1023 }
 0x41e   : > { %v1025_v44 = vsub.f32 %v1021_v63, %v1024_v41 }
 0x420   : > { %v1026_v45 = vmul.f32 1.442695, %v1025_v44 }
 0x421   : > { %v1191_v46 = vpop.xlane.xlu1 %1190 }
 0x422   : > { %3463 = vpow2.f32 %v1026_v45  ;;  %v1192_v47 = vsub.f32 %v1188_v4, %v1191_v46 }
 0x424   : > { %v1193_v48 = vmul.f32 1.442695, %v1192_v47 }
 0x425   : > { %v1358_v49 = vpop.xlane.xlu0 %1357 }
 0x426   : > { %3465 = vpow2.f32 %v1193_v48  ;;  %v1359_v50 = vsub.f32 %v1355_v9, %v1358_v49 }
 0x428   : > { %v1360_v51 = vmul.f32 1.442695, %v1359_v50 }
 0x429   : > { %v1525_v52 = vpop.xlane.xlu0 %1524 }
 0x42a   : > { %3467 = vpow2.f32 %v1360_v51  ;;  %v1526_v53 = vsub.f32 %v1522_v14, %v1525_v52 }
 0x42c   : > { %v3464_v54 = vpop.eup %3463  ;;  %v1527_v55 = vmul.f32 1.442695, %v1526_v53 }
 0x42d   : > { %v1028_v42 = vsel %vm941_vm3, %v3464_v54, 0.0  ;;  %v1713_v62 = vpop.xlane.xlu1 %1712 }
 0x42e   : > { %3469 = vpow2.f32 %v1527_v55  ;;  %1029 = vadd.xlane.f32.xlu1 %v1028_v42  ;;  %v1714_v63 = vsub.f32 %v1710_v20, %v1713_v62  ;;  %v2317_v62 = vld [vmem:[%s3704_s0 + $0x18] sm:$0xff] }
 0x430   : > { %v3466_v56 = vpop.eup %3465  ;;  %v1715_v3 = vmul.f32 1.442695, %v1714_v63 }
 0x431   : > { %v1195_v57 = vsel %vm941_vm3, %v3466_v56, 0.0  ;;  %v1880_v0 = vpop.xlane.xlu0 %1879 }
 0x432   : > { %1196 = vadd.xlane.f32.xlu0 %v1195_v57  ;;  %v1881_v2 = vsub.f32 %v1877_v25, %v1880_v0  ;;  %3471 = vpow2.f32 %v1715_v3 }
 0x434   : > { %v3468_v58 = vpop.eup %3467  ;;  %v1882_v6 = vmul.f32 1.442695, %v1881_v2 }
 0x435   : > { %v1362_v59 = vsel %vm941_vm3, %v3468_v58, 0.0  ;;  %v2047_v1 = vpop.xlane.xlu1 %2046 }
 0x436   : > { %1363 = vadd.xlane.f32.xlu1 %v1362_v59  ;;  %v2048_v4 = vsub.f32 %v2044_v30, %v2047_v1  ;;  %3473 = vpow2.f32 %v1882_v6  ;;  %v2315_v59 = vld [vmem:[%s3704_s0 + $0x8] sm:$0xff] }
 0x438   : > { %v3872_v60 = vpop.eup %3469  ;;  %v2049_v7 = vmul.f32 1.442695, %v2048_v4 }
 0x439   : > { %v1529_v61 = vsel %vm941_vm3, %v3872_v60, 0.0  ;;  %v2214_v5 = vpop.xlane.xlu0 %2213  ;;  %v1535_v18 = vpop.permute.xlu1 %1534 }
 0x43a   : > { %1530 = vadd.xlane.f32.xlu0 %v1529_v61  ;;  %v2215_v8 = vsub.f32 %v2211_v36, %v2214_v5  ;;  %3475 = vpow2.f32 %v2049_v7  ;;  %v2316_v61 = vld [vmem:[%s3704_s0 + $0x10] sm:$0xff] }
 0x43b   : > { %v3384_v63 = vpack.c.bf16 %v2317_v62, %v2316_v61  ;;  %v2599_v61 = vld [vmem:[%s3731_s20] sm:$0xff]  ;;  %v2600_v62 = vld [vmem:[%s3731_s20 + $0x8] sm:$0xff] }
 0x43c   : > { %v2216_v9 = vmul.f32 1.442695, %v2215_v8  ;;  %v3472_v10 = vpop.eup %3471 }
 0x43d   : > { %v1717_v12 = vsel %vm941_vm3, %v3472_v10, 0.0  ;;  %v1368_v19 = vpop.permute.xlu0 %1367 }
 0x43e   : > { %3477 = vpow2.f32 %v2216_v9 }
 0x440   : > { %v3880_v11 = vpop.eup %3473 }
 0x441   : > { %v1884_v15 = vsel %vm941_vm3, %v3880_v11, 0.0 }
 0x444   : > { %v3883_v13 = vpop.eup %3475 }
 0x445   : > { %v2051_v14 = vsel %vm941_vm3, %v3883_v13, 0.0 }
 0x447   : > { %1889 = vrot.lane.b32.xlu1 %v3795_v43, %s3560_s25 }
 0x448   : > { %v3889_v16 = vpop.eup %3477 }
 0x449   : > { %v2218_v17 = vsel %vm941_vm3, %v3889_v16, 0.0 }
 0x450   : > { %1722 = vrot.lane.b32.xlu0 %v3795_v43, %s3561_s24  ;;  %s4113_s24 = scalar_lea.vmem %s4073_s7, %s3689_s23 }
 0x46b   : > { %1718 = vadd.xlane.f32.xlu1 %v1717_v12 }
 0x46f   : > { %2052 = vadd.xlane.f32.xlu1 %v2051_v14  ;;  %1885 = vadd.xlane.f32.xlu0 %v1884_v15 }
 0x473   : > { %2219 = vadd.xlane.f32.xlu1 %v2218_v17 }
 0x484   : > { %2223 = vrot.lane.b32.xlu1 %v3795_v43, %s3562_s16  ;;  %s4115_s16 = scalar_lea.vmem %s4075_s9, %s3689_s23 }
 0x485   : > { %2056 = vrot.lane.b32.xlu0 %v3795_v43, %s3563_s6 }
 0x4bb   : > { %v1030_v20 = vpop.xlane.xlu1 %1029 }
 0x4bc   : > { %3479 = vrcp.f32 %v1030_v20  ;;  %v3122_v20 = vld [vmem:[%s4113_s24] ss:$0 sm:$0xff] }
 0x4bf   : > { %v1197_v21 = vpop.xlane.xlu0 %1196 }
 0x4c0   : > { %3481 = vrcp.f32 %v1197_v21 }
 0x4c3   : > { %v1364_v22 = vpop.xlane.xlu1 %1363 }
 0x4c4   : > { %3483 = vrcp.f32 %v1364_v22 }
 0x4c6   : > { %v3480_v23 = vpop.eup %3479 }
 0x4c7   : > { %v1032_v24 = vmul.f32 %v3480_v23, %v3464_v54  ;;  %v1531_v25 = vpop.xlane.xlu0 %1530  ;;  %v1890_v32 = vpop.permute.xlu1 %1889 }
 0x4c8   : > { %3485 = vrcp.f32 %v1531_v25 }
 0x4c9   : > { %3237 = vmatmul.mubr.msk.f32.vlgmr.msra.gmra.mrb[4].mxu1 %vm941_vm3, %v1032_v24 }
 0x4ca   : > { %v3482_v26 = vpop.eup %3481  ;;  %3245 = vmatpush3.msra.mxu1 %v3867_v40  ;;  %3246 = vmatprep.mubr.msk.f32.mxu1 %vm3552_vm2, %v3551_v38 }
 0x4cb   : > { %v1199_v43 = vmul.f32 %v3482_v26, %v3466_v56  ;;  %3254 = vmatprep.subr.mxu1 %v3551_v38  ;;  %v1723_v31 = vpop.permute.xlu0 %1722 }
 0x4cd   : > { %3247 = vmatmul.mubr.msk.f32.vlgmr.msra.gmra.mrb[6].mxu1 %vm941_vm3, %v1199_v43 }
 0x4ce   : > { %v3484_v27 = vpop.eup %3483  ;;  %3255 = vmatpush3.msra.mxu1 %v1368_v19  ;;  %3256 = vmatprep.mubr.msk.f32.mxu1 %vm3552_vm2, %v3551_v38 }
 0x4cf   : > { %v1366_v28 = vmul.f32 %v3484_v27, %v3468_v58  ;;  %3264 = vmatprep.subr.mxu1 %v3551_v38  ;;  %v2314_v58 = vld [vmem:[%s3704_s0] sm:$0xff] }
 0x4d1   : > { %3257 = vmatmul.mubr.msk.f32.vlgmr.msra.gmra.mrb[8].mxu1 %vm941_vm3, %v1366_v28 }
 0x4d2   : > { %v3486_v29 = vpop.eup %3485  ;;  %3265 = vmatpush3.msra.mxu1 %v1535_v18  ;;  %3266 = vmatprep.mubr.msk.f32.mxu1 %vm3552_vm2, %v3551_v38 }
 0x4d3   : > { %v1533_v30 = vmul.f32 %v3486_v29, %v3872_v60  ;;  %3274 = vmatprep.subr.mxu1 %v3551_v38  ;;  %v3380_v60 = vpack.c.bf16 %v2315_v59, %v2314_v58 }
 0x4d5   : > { %3267 = vmatmul.mubr.msk.f32.vlgmr.msra.gmra.mrb[10].mxu1 %vm941_vm3, %v1533_v30  ;;  %3381 = vmatprep.subr.bf16.mxu0 %v3380_v60 }
 0x4d6   : > { %3275 = vmatpush3.msra.mxu1 %v1723_v31  ;;  %3276 = vmatprep.mubr.msk.f32.mxu1 %vm3552_vm2, %v3551_v38 }
 0x4d7   : > { %3284 = vmatprep.subr.mxu1 %v3551_v38  ;;  %3383 = vmatpush3.bf16.msra.mxu0 %v3380_v60 }
 0x4d8   : > { %3385 = vmatprep.subr.bf16.mxu0 %v3384_v63 }
 0x4db   : > { %3387 = vmatpush3.bf16.msra.mxu0 %v3384_v63  ;;  %v3396_v63 = vpack.c.bf16 %v2600_v62, %v2599_v61 }
 0x4dd   : > { %3397 = vmatprep.subr.bf16.mxu0 %v3396_v63 }
 0x4f8   : > { %v1719_v33 = vpop.xlane.xlu1 %1718 }
 0x4f9   : > { %3487 = vrcp.f32 %v1719_v33 }
 0x4fc   : > { %v2053_v34 = vpop.xlane.xlu1 %2052  ;;  %v1886_v36 = vpop.xlane.xlu0 %1885 }
 0x4fd   : > { %3489 = vrcp.f32 %v1886_v36 }
 0x4fe   : > { %3491 = vrcp.f32 %v2053_v34 }
 0x500   : > { %v2220_v39 = vpop.xlane.xlu1 %2219  ;;  %v2057_v47 = vpop.permute.xlu0 %2056 }
 0x501   : > { %3493 = vrcp.f32 %v2220_v39  ;;  %v2453_v39 = vld [vmem:[%s3721_s28] sm:$0xff] }
 0x503   : > { %v3488_v40 = vpop.eup %3487 }
 0x504   : > { %v1721_v41 = vmul.f32 %v3488_v40, %v3472_v10  ;;  %v2224_v50 = vpop.permute.xlu1 %2223  ;;  %v2454_v40 = vld [vmem:[%s3721_s28 + $0x8] sm:$0xff] }
 0x506   : > { %3277 = vmatmul.mubr.msk.f32.vlgmr.msra.gmra.mrb[12].mxu1 %vm941_vm3, %v1721_v41  ;;  %v3388_v41 = vpack.c.bf16 %v2454_v40, %v2453_v39 }
 0x507   : > { %3285 = vmatpush3.msra.mxu1 %v1890_v32  ;;  %3286 = vmatprep.mubr.msk.f32.mxu1 %vm3552_vm2, %v3551_v38  ;;  %v3490_v44 = vpop.eup %3489 }
 0x508   : > { %3294 = vmatprep.subr.mxu1 %v3551_v38  ;;  %v1888_v45 = vmul.f32 %v3490_v44, %v3880_v11  ;;  %v3492_v46 = vpop.eup %3491  ;;  %v2455_v44 = vld [vmem:[%s3721_s28 + $0x10] sm:$0xff] }
 0x509   : > { %v2055_v48 = vmul.f32 %v3492_v46, %v3883_v13 }
 0x50a   : > { %3287 = vmatmul.mubr.msk.f32.vlgmr.msra.gmra.mrb[14].mxu1 %vm941_vm3, %v1888_v45  ;;  %v2456_v45 = vld [vmem:[%s3721_s28 + $0x18] sm:$0xff] }
 0x50b   : > { %3295 = vmatpush3.msra.mxu1 %v2057_v47  ;;  %3296 = vmatprep.mubr.msk.f32.mxu1 %vm3552_vm2, %v3551_v38  ;;  %v3494_v49 = vpop.eup %3493  ;;  %v3392_v46 = vpack.c.bf16 %v2456_v45, %v2455_v44 }
 0x50c   : > { %3304 = vmatprep.subr.mxu1 %v3551_v38  ;;  %v2222_v51 = vmul.f32 %v3494_v49, %v3889_v16 }
 0x50e   : > { %3297 = vmatmul.mubr.msk.f32.vlgmr.msra.gmra.mrb[16].mxu1 %vm941_vm3, %v2055_v48 }
 0x50f   : > { %3305 = vmatpush3.msra.mxu1 %v2224_v50  ;;  %3306 = vmatprep.mubr.msk.f32.mxu1 %vm3552_vm2, %v3551_v38 }
 0x510   : > { %3389 = vmatprep.subr.bf16.mxu1 %v3388_v41 }
 0x512   : > { %3307 = vmatmul.mubr.msk.f32.vlgmr.msra.gmra.mrb[18].mxu1 %vm941_vm3, %v2222_v51 }
 0x513   : > { %3391 = vmatpush3.bf16.msra.mxu1 %v3388_v41 }
 0x514   : > { %3393 = vmatprep.subr.bf16.mxu1 %v3392_v46 }
 0x517   : > { %3395 = vmatpush3.bf16.msra.mxu1 %v3392_v46 }
 0x59c   : > { %v1105_v52 = vpop.f32.mrb[4].mxu1 }
 0x59d   : > { %v3238_v53 = vpop.f32.mrb[5].mxu1 }
 0x5a0   : > { %v1272_v54 = vpop.f32.mrb[6].mxu1 }
 0x5a1   : > { %1611 = vrot.lane.b32.xlu0 %v1272_v54, %s3564_s3  ;;  %v3248_v55 = vpop.f32.mrb[7].mxu1  ;;  %v3125_v54 = vld [vmem:[%s4114_s30] ss:$0 sm:$0xff]  ;;  %s4119_s30 = sld [smem:[#allocation14_spill]] (!%p3135_p5) }
 0x5a4   : > { %v1439_v42 = vpop.f32.mrb[8].mxu1 }
 0x5a5   : > { %1615 = vrot.lane.b32.xlu1 %v1439_v42, %s3565_s17  ;;  %v3258_v56 = vpop.f32.mrb[9].mxu1  ;;  %v3126_v42 = vld [vmem:[%s4115_s16] ss:$0 sm:$0xff] }
 0x5a8   : > { %v1606_v57 = vpop.f32.mrb[10].mxu1 }
 0x5a9   : > { %1619 = vrot.lane.b32.xlu1 %v1606_v57, %s3566_s19  ;;  %v3268_v38 = vpop.f32.mrb[11].mxu1 }
 0x5d9   : > { %v1794_v0 = vpop.f32.mrb[12].mxu1 }
 0x5da   : > { %v3278_v1 = vpop.f32.mrb[13].mxu1 }
 0x5db   : > { %v2602_v1 = vld [vmem:[%s3731_s20 + $0x18] sm:$0xff] }
 0x5dd   : > { %v1961_v2 = vpop.f32.mrb[14].mxu1 }
 0x5de   : > { %2300 = vrot.lane.b32.xlu0 %v1961_v2, %s3564_s3  ;;  %v3288_v3 = vpop.f32.mrb[15].mxu1 }
 0x5df   : > { %v2603_v3 = vld [vmem:[%s3731_s20 + $0x20] sm:$0xff] }
 0x5e1   : > { %v2128_v4 = vpop.f32.mrb[16].mxu1 }
 0x5e2   : > { %2304 = vrot.lane.b32.xlu0 %v2128_v4, %s3565_s17  ;;  %v3298_v5 = vpop.f32.mrb[17].mxu1  ;;  %v2604_v4 = vld [vmem:[%s3731_s20 + $0x28] sm:$0xff]  ;;  %s4116_s17 = scalar_lea.vmem %s4077_s11, %s3689_s23  ;;  %s4120_s23 = sld [smem:[#allocation16_spill]] (!%p3135_p5) }
 0x5e3   : > { %v3404_v5 = vpack.c.bf16 %v2604_v4, %v2603_v3  ;;  %v3130_v3 = vld [vmem:[%s781_s2] ss:$0 sm:$0xff] }
 0x5e5   : > { %v2295_v6 = vpop.f32.mrb[18].mxu1 }
 0x5e6   : > { %2308 = vrot.lane.b32.xlu1 %v2295_v6, %s3566_s19  ;;  %v3308_v7 = vpop.f32.mrb[19].mxu1  ;;  %v2605_v6 = vld [vmem:[%s3731_s20 + $0x30] sm:$0xff] }
 0x5e7   : > { %v2606_v7 = vld [vmem:[%s3731_s20 + $0x38] sm:$0xff] }
 0x613   : > { %v1612_v8 = vpop.permute.xlu0 %1611 }
 0x614   : > { %v1622_v10 = vsel %vm941_vm3, %v1105_v52, %v1612_v8  ;;  %v3408_v8 = vpack.c.bf16 %v2606_v7, %v2605_v6 }
 0x617   : > { %v1616_v9 = vpop.permute.xlu1 %1615 }
 0x618   : > { %v1624_v11 = vsel %vm1623_vm4, %v1622_v10, %v1616_v9  ;;  %v3127_v9 = vld [vmem:[%s4116_s17] ss:$0 sm:$0xff]  ;;  %s4118_s17 = sld [smem:[#allocation15_spill]] (!%p3135_p5) }
 0x61b   : > { %v1620_v12 = vpop.permute.xlu1 %1619 }
 0x61c   : > { %v1626_v13 = vsel %vm1625_vm5, %v1624_v11, %v1620_v12 }
 0x61d   : > { %3317 = vmatprep.mubr.msk.f32.mxu0 %vm855_vm1, %v1626_v13 }
 0x650   : > { %v2301_v14 = vpop.permute.xlu0 %2300 }
 0x651   : > { %v2311_v16 = vsel %vm941_vm3, %v1794_v0, %v2301_v14  ;;  %v2601_v0 = vld [vmem:[%s3731_s20 + $0x10] sm:$0xff] }
 0x652   : > { %v3400_v2 = vpack.c.bf16 %v2602_v1, %v2601_v0 }
 0x654   : > { %v2305_v15 = vpop.permute.xlu0 %2304 }
 0x655   : > { %v2312_v17 = vsel %vm1623_vm4, %v2311_v16, %v2305_v15 }
 0x658   : > { %v2309_v18 = vpop.permute.xlu1 %2308 }
 0x659   : > { %v2313_v19 = vsel %vm1625_vm5, %v2312_v17, %v2309_v18 }
 0x65a   : > { %3318 = vmatmul.mubr.msk.f32.vlgmr.msra.gmra.mrb[14].mxu0 %vm855_vm1, %v2313_v19 }
 0x65b   : > { %3399 = vmatpush3.bf16.msra.mxu0 %v3396_v63 }
 0x65c   : > { %3401 = vmatprep.subr.bf16.mxu0 %v3400_v2 }
 0x65f   : > { %3403 = vmatpush3.bf16.msra.mxu0 %v3400_v2 }
 0x660   : > { %3405 = vmatprep.subr.bf16.mxu0 %v3404_v5 }
 0x663   : > { %3407 = vmatpush3.bf16.msra.mxu0 %v3404_v5 }
 0x664   : > { %3409 = vmatprep.subr.bf16.mxu0 %v3408_v8 }
 0x667   : > { %3411 = vmatpush3.bf16.msra.mxu0 %v3408_v8 }
 0x72d   : > { %v3319_v21 = vpop.f32.mrb[14].mxu0 }
 0x72e   : > { %v2403_v22 = vadd.f32 %v3319_v21, %v3122_v20  ;;  %v2397_v23 = vpop.f32.mrb[15].mxu0 }
 0x72f   : > { %v2398_v24 = vadd.f32 %v3122_v20, %v2397_v23 }
 0x730   : > { %v2407_v25 = vadd.f32 %v2403_v22, %v3772_v37 }
 0x731   : > { %v2406_v26 = vadd.f32 %v2398_v24, %v3768_v35 }
 0x732   : > { %v2413_v43 = vsel %vm855_vm1, %v2407_v25, 0.0 }
 0x733   : > { %2414 = vadd.xlane.f32.xlu1 %v2413_v43  ;;  %v2410_v27 = vsel %vm855_vm1, %v2406_v26, 0.0 }
 0x734   : > { %2411 = vadd.xlane.f32.xlu0 %v2410_v27 }
 0x7c0   : > { %v2415_v28 = vpop.xlane.xlu1 %2414 }
 0x7c1   : > { %v2418_v29 = vmul.f32 0.03125, %v2415_v28  ;;  %v2412_v30 = vpop.xlane.xlu0 %2411 }
 0x7c2   : > { %v2417_v31 = vmul.f32 0.03125, %v2412_v30 }
 0x7c3   : > { %v2420_v32 = vsub.f32 %v2407_v25, %v2418_v29 }
 0x7c4   : > { %v2419_v33 = vsub.f32 %v2406_v26, %v2417_v31 }
 0x7c5   : > { %v2422_v35 = vmul.f32 %v2420_v32, %v2420_v32 }
 0x7c6   : > { %v2421_v34 = vmul.f32 %v2419_v33, %v2419_v33 }
 0x7c7   : > { %v2426_v36 = vsel %vm855_vm1, %v2422_v35, 0.0 }
 0x7c8   : > { %v2423_v37 = vsel %vm855_vm1, %v2421_v34, 0.0 }
 0x7c9   : > { %2424 = vadd.xlane.f32.xlu0 %v2423_v37 }
 0x7cd   : > { %2427 = vadd.xlane.f32.xlu0 %v2426_v36 }
 0x856   : > { %v2425_v47 = vpop.xlane.xlu0 %2424 }
 0x857   : > { %v2429_v48 = vmul.f32 0.03125, %v2425_v47 }
 0x859   : > { %v2431_v49 = vadd.f32 1e-12, %v2429_v48 }
 0x85a   : > { %v2428_v50 = vpop.xlane.xlu0 %2427 }
 0x85b   : > { %3495 = vrsqrt.f32 %v2431_v49  ;;  %v2430_v51 = vmul.f32 0.03125, %v2428_v50 }
 0x85d   : > { %v2432_v52 = vadd.f32 1e-12, %v2430_v51 }
 0x85f   : > { %3497 = vrsqrt.f32 %v2432_v52 }
 0x865   : > { %v3496_v53 = vpop.eup %3495 }
 0x866   : > { %v2435_v55 = vmul.f32 %v3496_v53, %v2419_v33 }
 0x868   : > { %v2443_v56 = vmul.f32 %v3125_v54, %v2435_v55  ;;  %v3567_v55 = vmov -1.0  }
 0x869   : > { %v3498_v57 = vpop.eup %3497 }
 0x86a   : > { %v2436_v38 = vmul.f32 %v3498_v57, %v2420_v32  ;;  %v3963_v58 = vadd.f32 %v3126_v42, %v2443_v56 }
 0x86c   : > { %v2444_v59 = vmul.f32 %v3125_v54, %v2436_v38  ;;  %3328 = vmatprep.mubr.msk.f32.mxu1 %vm855_vm1, %v3963_v58 }
 0x86e   : > { %v3967_v60 = vadd.f32 %v3126_v42, %v2444_v59 }
 0x870   : > { %3329 = vmatmul.mubr.msk.f32.vlgmr.msra.gmra.mrb[20].mxu1 %vm855_vm1, %v3967_v60 }
 0x943   : > { %v3330_v10 = vpop.f32.mrb[20].mxu1 }
 0x944   : > { %v2542_v11 = vadd.f32 %v3330_v10, %v3127_v9  ;;  %v2536_v12 = vpop.f32.mrb[21].mxu1 }
 0x945   : > { %v2537_v13 = vadd.f32 %v3127_v9, %v2536_v12 }
 0x946   : > { %v2548_v14 = vmul.f32 0.70710677, %v2542_v11  ;;  %v2546_v0 = vmul.f32 0.5, %v2542_v11 }
 0x947   : > { %v2547_v15 = vmul.f32 0.70710677, %v2537_v13  ;;  %v2545_v62 = vmul.f32 0.5, %v2537_v13 }
 0x948   : > { %v2554_v16 = vand.u32 2147483647, %v2548_v14  ;;  %vm2550_vm6 = vcmp.ge.f32.partialorder %v2548_v14, 0.0 }
 0x949   : > { %v2553_v17 = vand.u32 2147483647, %v2547_v15  ;;  %vm2549_vm7 = vcmp.ge.f32.partialorder %v2547_v15, 0.0  ;;  %v2552_v42 = vsel %vm2550_vm6, 1.0, %v3567_v55 }
 0x94a   : > { %v2556_v18 = vmul.f32 0.3275911, %v2554_v16  ;;  %v2582_v22 = vsub.f32 0.0, %v2554_v16  ;;  %v2551_v38 = vsel %vm2549_vm7, 1.0, %v3567_v55 }
 0x94b   : > { %v2555_v19 = vmul.f32 0.3275911, %v2553_v17  ;;  %v2581_v23 = vsub.f32 0.0, %v2553_v17 }
 0x94c   : > { %v2558_v20 = vadd.f32 1.0, %v2556_v18  ;;  %v2584_v25 = vmul.f32 %v2582_v22, %v2554_v16 }
 0x94d   : > { %v2557_v21 = vadd.f32 1.0, %v2555_v19  ;;  %v2583_v27 = vmul.f32 %v2581_v23, %v2553_v17 }
 0x94e   : > { %3499 = vrcp.f32 %v2558_v20  ;;  %v2587_v30 = vmul.f32 1.442695, %v2584_v25 }
 0x94f   : > { %3501 = vrcp.f32 %v2557_v21  ;;  %v2585_v33 = vmul.f32 1.442695, %v2583_v27 }
 0x950   : > { %3503 = vpow2.f32 %v2587_v30 }
 0x951   : > { %3505 = vpow2.f32 %v2585_v33 }
 0x958   : > { %v3500_v24 = vpop.eup %3499 }
 0x959   : > { %v3502_v26 = vpop.eup %3501  ;;  %v2564_v43 = vmul.f32 1.0614054, %v3500_v24 }
 0x95a   : > { %v2563_v28 = vmul.f32 1.0614054, %v3502_v26  ;;  %v3504_v49 = vpop.eup %3503 }
 0x95b   : > { %v2566_v29 = vadd.f32 -1.4531521, %v2564_v43  ;;  %v3506_v51 = vpop.eup %3505  ;;  %v3133_v43 = vld [vmem:[%s784_s26] ss:$0 sm:$0xff] }
 0x95c   : > { %v2565_v31 = vadd.f32 -1.4531521, %v2563_v28 }
 0x95d   : > { %v2568_v32 = vmul.f32 %v3500_v24, %v2566_v29  ;;  %v3134_v29 = vld [vmem:[%s787_s18] ss:$0 sm:$0xff] }
 0x95e   : > { %v2567_v34 = vmul.f32 %v3502_v26, %v2565_v31 }
 0x95f   : > { %v2570_v37 = vadd.f32 1.4214138, %v2568_v32 }
 0x960   : > { %v2569_v35 = vadd.f32 1.4214138, %v2567_v34 }
 0x961   : > { %v2572_v36 = vmul.f32 %v3500_v24, %v2570_v37  ;;  %v2753_v37 = vld [vmem:[%s4117_s27] sm:$0xff] (!%p3135_p5) }
 0x962   : > { %v2571_v39 = vmul.f32 %v3502_v26, %v2569_v35  ;;  %v2754_v35 = vld [vmem:[%s4117_s27 + $0x8] sm:$0xff] (!%p3135_p5) }
 0x963   : > { %v2574_v40 = vadd.f32 -0.28449672, %v2572_v36  ;;  %v2755_v36 = vld [vmem:[%s4117_s27 + $0x10] sm:$0xff] (!%p3135_p5) }
 0x964   : > { %v2573_v41 = vadd.f32 -0.28449672, %v2571_v39  ;;  %v3568_v39 = vmov (!%p3135_p5), 0.0|0.0  }
 0x965   : > { %v2576_v44 = vmul.f32 %v3500_v24, %v2574_v40  ;;  %3412 = vmatprep.subr.bf16.mxu0 (!%p3135_p5), %v3568_v39  ;;  %v3413_v40 = vpack.c.bf16 (!%p3135_p5), %v2754_v35, %v2753_v37  ;;  %3418 = vmatprep.subr.bf16.mxu1 (!%p3135_p5), %v3568_v39 }
 0x966   : > { %v2575_v45 = vmul.f32 %v3502_v26, %v2573_v41  ;;  %v2756_v41 = vld [vmem:[%s4117_s27 + $0x18] sm:$0xff] (!%p3135_p5) }
 0x967   : > { %v2578_v46 = vadd.f32 0.2548296, %v2576_v44  ;;  %v3570_v44 = vmov (!%p3135_p5), 0.0  }
 0x968   : > { %v2577_v47 = vadd.f32 0.2548296, %v2575_v45  ;;  %3369 = vmatprep.mubr.msk.f32.mxu1 (!%p3135_p5), %vm3569_vm9, %v3570_v44  ;;  %v3416_v45 = vpack.c.bf16 (!%p3135_p5), %v2756_v41, %v2755_v36 }
 0x969   : > { %v2580_v48 = vmul.f32 %v3500_v24, %v2578_v46 }
 0x96a   : > { %v2579_v50 = vmul.f32 %v3502_v26, %v2577_v47 }
 0x96b   : > { %v2590_v52 = vmul.f32 %v3504_v49, %v2580_v48  ;;  %v2838_v48 = vld [vmem:[%s4118_s17] sm:$0xff] (!%p3135_p5)  ;;  %v2839_v49 = vld [vmem:[%s4118_s17 + $0x8] sm:$0xff] (!%p3135_p5) }
 0x96c   : > { %v2589_v53 = vmul.f32 %v3506_v51, %v2579_v50  ;;  %v2840_v50 = vld [vmem:[%s4118_s17 + $0x10] sm:$0xff] (!%p3135_p5)  ;;  %v3419_v51 = vpack.c.bf16 (!%p3135_p5), %v2839_v49, %v2838_v48 }
 0x96d   : > { %v2592_v54 = vsub.f32 1.0, %v2590_v52  ;;  %v2841_v52 = vld [vmem:[%s4118_s17 + $0x18] sm:$0xff] (!%p3135_p5) }
 0x96e   : > { %v2591_v56 = vsub.f32 1.0, %v2589_v53  ;;  %3420 = vmatpush3.bf16.msra.mxu1 (!%p3135_p5), %v3419_v51  ;;  %v3422_v53 = vpack.c.bf16 (!%p3135_p5), %v2841_v52, %v2840_v50 }
 0x96f   : > { %v2594_v57 = vmul.f32 %v2592_v54, %v2552_v42  ;;  %3421 = vmatprep.subr.bf16.mxu1 (!%p3135_p5), %v3568_v39  ;;  %v3136_v54 = vld [vmem:[%s4119_s30] ss:$0 sm:$0xff] (!%p3135_p5) }
 0x970   : > { %v2593_v59 = vmul.f32 %v2591_v56, %v2551_v38  ;;  %v3138_v38 = vld [vmem:[%s4120_s23] ss:$0 sm:$0xff] (!%p3135_p5) }
 0x971   : > { %v2596_v61 = vadd.f32 1.0, %v2594_v57 }
 0x972   : > { %v2595_v63 = vadd.f32 1.0, %v2593_v59  ;;  %3423 = vmatpush3.bf16.msra.mxu1 (!%p3135_p5), %v3422_v53 }
 0x973   : > { %v2598_v2 = vmul.f32 %v2596_v61, %v2546_v0 }
 0x974   : > { %v2597_v1 = vmul.f32 %v2595_v63, %v2545_v62 }
 0x976   : > { %3347 = vmatprep.mubr.msk.f32.mxu0 %vm2614_vm8, %v2597_v1 }
 0x977   : > { %3348 = vmatmul.mubr.msk.f32.vlgmr.msra.gmra.mrb[16].mxu0 %vm2614_vm8, %v2598_v2 }
 0x978   : > { %3358 = vmatprep.mubr.msk.f32.mxu0 (!%p3135_p5), %vm3569_vm9, %v3570_v44  ;;  %3414 = vmatpush3.bf16.msra.mxu0 (!%p3135_p5), %v3413_v40 }
 0x979   : > { %3415 = vmatprep.subr.bf16.mxu0 (!%p3135_p5), %v3568_v39 }
 0x97c   : > { %3417 = vmatpush3.bf16.msra.mxu0 (!%p3135_p5), %v3416_v45 }
 0xa4a   : > { %v3349_v4 = vpop.f32.mrb[16].mxu0 }
 0xa4b   : > { %v2693_v5 = vadd.f32 %v3349_v4, %v3130_v3  ;;  %v2687_v6 = vpop.f32.mrb[17].mxu0 }
 0xa4c   : > { %v2688_v7 = vadd.f32 %v3130_v3, %v2687_v6 }
 0xa4d   : > { %v2697_v8 = vadd.f32 %v2693_v5, %v3967_v60 }
 0xa4e   : > { %v2696_v9 = vadd.f32 %v2688_v7, %v3963_v58 }
 0xa4f   : > { %v2703_v10 = vsel %vm855_vm1, %v2697_v8, 0.0 }
 0xa50   : > { %2704 = vadd.xlane.f32.xlu0 %v2703_v10  ;;  %v2700_v11 = vsel %vm855_vm1, %v2696_v9, 0.0 }
 0xa51   : > { %2701 = vadd.xlane.f32.xlu1 %v2700_v11 }
 0xadd   : > { %v2705_v12 = vpop.xlane.xlu0 %2704 }
 0xade   : > { %v2707_v13 = vmul.f32 0.03125, %v2705_v12  ;;  %v2702_v14 = vpop.xlane.xlu1 %2701 }
 0xadf   : > { %v2706_v15 = vmul.f32 0.03125, %v2702_v14 }
 0xae0   : > { %v2709_v16 = vsub.f32 %v2697_v8, %v2707_v13 }
 0xae1   : > { %v2708_v17 = vsub.f32 %v2696_v9, %v2706_v15 }
 0xae2   : > { %v2711_v18 = vmul.f32 %v2709_v16, %v2709_v16 }
 0xae3   : > { %v2710_v19 = vmul.f32 %v2708_v17, %v2708_v17 }
 0xae4   : > { %v2715_v20 = vsel %vm855_vm1, %v2711_v18, 0.0 }
 0xae5   : > { %2716 = vadd.xlane.f32.xlu0 %v2715_v20  ;;  %v2712_v58 = vsel %vm855_vm1, %v2710_v19, 0.0 }
 0xae6   : > { %2713 = vadd.xlane.f32.xlu1 %v2712_v58 }
 0xb72   : > { %v2717_v60 = vpop.xlane.xlu0 %2716 }
 0xb73   : > { %v2719_v21 = vmul.f32 0.03125, %v2717_v60  ;;  %v2714_v22 = vpop.xlane.xlu1 %2713 }
 0xb74   : > { %v2718_v23 = vmul.f32 0.03125, %v2714_v22 }
 0xb75   : > { %v2721_v24 = vadd.f32 1e-12, %v2719_v21 }
 0xb76   : > { %v2720_v25 = vadd.f32 1e-12, %v2718_v23 }
 0xb77   : > { %3507 = vrsqrt.f32 %v2721_v24 }
 0xb78   : > { %3509 = vrsqrt.f32 %v2720_v25 }
 0xb81   : > { %v3508_v26 = vpop.eup %3507 }
 0xb82   : > { %v3510_v27 = vpop.eup %3509  ;;  %v2725_v28 = vmul.f32 %v3508_v26, %v2709_v16 }
 0xb83   : > { %v2724_v30 = vmul.f32 %v3510_v27, %v2708_v17  ;;  %2747 = sbr.rel (%p3135_p5) target bundleno = 3395 (0xd43), region = 108 }
 0xb84   : > { %v2733_v31 = vmul.f32 %v3133_v43, %v2725_v28 }
 0xb85   : > { %v2732_v32 = vmul.f32 %v3133_v43, %v2724_v30 }
 0xb86   : > { %v2741_v33 = vadd.f32 %v3134_v29, %v2733_v31 }
 0xb87   : > { %v2740_v34 = vadd.f32 %v3134_v29, %v2732_v32 }
 0xb88   : > { %2743 = vst.msk [vmem:[#allocation2 + $0x8] sm:$0xff] %vm855_vm1, %v2741_v33  ;;  %v2749_v46 = vrot.slane (!%p3135_p5), %v2741_v33, 7 }
 0xb89   : > { %2742 = vst.msk [vmem:[#allocation2] sm:$0xff] %vm855_vm1, %v2740_v34 }
 0xb8a   : > { %v2752_v47 = vsel %vm2751_vm10, %v2740_v34, %v2749_v46 }
 0xb8b   : > { %3359 = vmatmul.mubr.msk.f32.vlgmr.msra.gmra.mrb[0].mxu0 %vm855_vm1, %v2752_v47 }
 0xc5e   : > { %v2833_v55 = vpop.f32.mrb[0].mxu0 }
 0xc5f   : > { %v2834_v42 = vadd.f32 %v3136_v54, %v2833_v55  ;;  %v3360_v56 = vpop.f32.mrb[1].mxu0 }
 0xc61   : > { %3511 = vtanh.f32 %v2834_v42 }
 0xc6b   : > { %v3512_v57 = vpop.eup %3511 }
 0xc6c   : > { %3370 = vmatmul.mubr.msk.f32.vlgmr.msra.gmra.mrb[0].mxu1 %vm855_vm1, %v3512_v57 }
 0xd3f   : > { %v2918_v59 = vpop.f32.mrb[0].mxu1 }
 0xd40   : > { %v2919_v61 = vadd.f32 %v3138_v38, %v2918_v59  ;;  %v3371_v62 = vpop.f32.mrb[1].mxu1 }
 0xd42   : > { %2923 = vst.msk [vmem:[#allocation3] sm:$0x3] %vm2922_vm11, %v2919_v61 }
 0xd43 PF: > { %p3428_p6 = scmp.eq.s32.totalorder %s3683_s22, 1  ;;  %s3571_s1 = smov [#allocation3]  }
 0xd44   : > { %s2931_s16 = sshll.u32 %s3571_s1, 4  ;;  %s2932_s16 = int_to_ptr.vmem [resolvable:$true] %s2931_s16 }
 0xd45   : > { %s3513_s6 = scalar_lea.vmem %s2932_s16, 32  ;;  %p3520_p10 = scmp.lt.s32.totalorder %s2932_s16, %s2932_s16 }
 0xd46   : > { %p3514_p7 = scmp.ne.s32.totalorder %s2932_s16, %s3513_s6  ;;  %p3521_p11 = scmp.lt.s32.totalorder %s3513_s6, %s3513_s6 }
 0xd48   : > { %p3515_p8 = pnand %p3514_p7, %p3428_p6  ;;  %p3522_p12 = por %p3521_p11, %p3520_p10 }
 0xd4a   : > { %p3516_p9 = pneg %p3515_p8 }
 0xd4c   : > { %p3523_p13 = pnand %p3522_p12, %p3516_p9 }
 0xd4e   : > { %3526 = shalt.err (!%p3523_p13)
}
 0xd4f   : > { %s4121_s19 = sld [smem:[#allocation17_spill]] }
 0xd55   : > { %s3527_s2 = scalar_lea.hbm %s4121_s19, 32 }
 0xd56   : > { %p3528_p0 = scmp.ne.s32.totalorder %s4121_s19, %s3527_s2  ;;  %p3533_p3 = scmp.lt.u32.totalorder %s3527_s2, %s4121_s19 }
 0xd58   : > { %p3529_p1 = pnand %p3528_p0, %p3428_p6 }
 0xd5a   : > { %p3530_p2 = pneg %p3529_p1 }
 0xd5c   : > { %p3535_p4 = pnand %p3533_p3, %p3530_p2 }
 0xd5e   : > { %3538 = shalt.err (!%p3535_p4)
}
 0xd5f   : > { %3425 = dma.vmem_to_hbm [thread:$0]  (%p3428_p6), %s2932_s16, 32, %s4121_s19, [#allocation4]  }
 0xd60   : > { %3544 = dma.done.wait (%p3428_p6), [#allocation4], 32  }
 0xd61   : > { %3546 = vsyncadd (%p3428_p6), [#allocation4], 4294967264 }
 0xd62 PF: > { %s4122_s28 = sld [smem:[#allocation6_spill]] }
 0xd68   : > { %s31_s1 = sadd.s32 1, %s4122_s28  }
 0xd69   : > { %p28_p5 = scmp.ge.s32.totalorder %s31_s1, 4  }
 0xd6b   :  { %30 = sbr.rel (!%p28_p5) target bundleno = 13 (0xd), region = 168 }
 0xd72   :  { %2944 = vsyncpa [#allocation4], 1 }
 0xd73   :  { %2946 = vsyncpa [#allocation4 + $0x1], 1 }

</bundles_post_ra>
